<compile_context>
chip_gen: v7x
topology: tpu7x:2x2x1
jax: 0.10.0
libtpu: 0.0.40
codegen_flags: <defaults>
</compile_context>

<pallas_src>
import functools

import numpy as np
import jax
import jax.numpy as jnp
from jax.experimental import pallas as pl
from jax.experimental.pallas import tpu as pltpu


def _pick_vmem_limit():
    """96 MiB on 128-MiB VMEM parts (v5e/v6e), conservative elsewhere (v7x)."""
    try:
        cap = int(pltpu.get_tpu_info().vmem_capacity_bytes)
    except Exception:
        cap = 0
    if cap <= 0:
        return 48 * 1024 * 1024
    return int(min(96 * 1024 * 1024, (cap * 3) // 4))


_VMEM_LIMIT = _pick_vmem_limit()


# ----------------------------- Pallas kernels ------------------------------

def _conv1x1_kernel(w_ref, b_ref, x_ref, o_ref):
    # w: [Cout, Cin], b: [Cout, 1], x: [1, Cin, TP] -> o: [1, Cout, TP]
    # TODO(synk): bias could be folded into the matmul (ones-row trick); left as a
    # (Cout,1) lane-broadcast add since it is negligible next to the HBM traffic.
    o_ref[0] = (jnp.dot(w_ref[...], x_ref[0],
                        preferred_element_type=jnp.float32)
                + b_ref[...]).astype(o_ref.dtype)


def conv1x1_nchw(x, w, b, *, pixel_tile=2048):
    """1x1 conv, channel-first: x [B, Cin, P], w [Cout, Cin], b [Cout]."""
    B, Cin, P = x.shape
    Cout = w.shape[0]
    tp = P if P <= pixel_tile else pixel_tile     # pixel_tile is a multiple of 128
    grid = (B, pl.cdiv(P, tp))
    return pl.pallas_call(
        _conv1x1_kernel,
        out_shape=jax.ShapeDtypeStruct((B, Cout, P), jnp.float32),
        grid=grid,
        in_specs=[
            pl.BlockSpec((Cout, Cin), lambda bi, pi: (0, 0)),
            pl.BlockSpec((Cout, 1), lambda bi, pi: (0, 0)),
            pl.BlockSpec((1, Cin, tp), lambda bi, pi: (bi, 0, pi)),
        ],
        out_specs=pl.BlockSpec((1, Cout, tp), lambda bi, pi: (bi, 0, pi)),
        compiler_params=pltpu.CompilerParams(
            dimension_semantics=("parallel", "parallel"),
            vmem_limit_bytes=_VMEM_LIMIT),
    )(w, b.reshape(Cout, 1), x)


def _cluster_kernel(ab_ref, pool_ref, cen_ref, val_ref, o_ref, *,
                    fold_w, fold_h, w, h):
    # ab_ref:   (2,) f32 in SMEM -> (sim_alpha, sim_beta)
    # pool_ref: (N, M) adaptive-avg-pool matrix, transposed (shared)
    # cen_ref:  (1, C, W0, H0) center-projection slab for this (batch, head)
    # val_ref:  (1, C, W0, H0) value-projection slab
    # o_ref:    (1, C, W0, H0) dispatched patches, written back in image layout
    alpha = ab_ref[0]
    beta = ab_ref[1]
    cen_img = cen_ref[0].astype(jnp.float32)          # [C, W0, H0]
    val_img = val_ref[0].astype(jnp.float32)
    C = cen_img.shape[0]
    F = fold_w * fold_h
    N = w * h
    M = pool_ref.shape[1]

    # --- fold regroup done on VMEM-resident data: no HBM transpose passes ---
    x_slabs, v_slabs = [], []
    for f1 in range(fold_w):
        for f2 in range(fold_h):
            ws, hs = f1 * w, f2 * h
            x_slabs.append(cen_img[:, ws:ws + w, hs:hs + h])
            v_slabs.append(val_img[:, ws:ws + w, hs:hs + h])
    x_tok = jnp.stack(x_slabs, axis=0).reshape(F, C, N)    # [F, C, N]
    v_tok = jnp.stack(v_slabs, axis=0).reshape(F, C, N)    # [F, C, N]

    pool_t = pool_ref[...].astype(jnp.float32)             # [N, M]

    # adaptive-avg-pool centers as ONE flat MXU matmul: [(F*C), N] @ [N, M]
    centers = jnp.dot(x_tok.reshape(F * C, N), pool_t,
                      preferred_element_type=jnp.float32).reshape(F, C, M)
    value_centers = jnp.dot(v_tok.reshape(F * C, N), pool_t,
                            preferred_element_type=jnp.float32).reshape(F, C, M)

    # pairwise cosine similarity (F.normalize semantics); rsqrt -> EUP
    xn = x_tok * jax.lax.rsqrt(jnp.maximum(
        jnp.sum(x_tok * x_tok, axis=1, keepdims=True), 1e-24))          # [F, C, N]
    cn = centers * jax.lax.rsqrt(jnp.maximum(
        jnp.sum(centers * centers, axis=1, keepdims=True), 1e-24))      # [F, C, M]
    cos = jnp.einsum('fcm,fcn->fmn', cn, xn,
                     preferred_element_type=jnp.float32)                # [F, M, N]
    sim = jax.nn.sigmoid(beta + alpha * cos)

    # hard assignment: one-hot of argmax over the center axis (first idx on ties),
    # matching torch's sim.max(dim=1) + scatter_.
    rows = jax.lax.broadcasted_iota(jnp.int32, sim.shape, 1)
    smax = jnp.max(sim, axis=1, keepdims=True)
    idx = jnp.min(jnp.where(sim == smax, rows, M), axis=1, keepdims=True)
    sim = jnp.where(rows == idx, sim, 0.0)

    denom = jnp.sum(sim, axis=2) + 1.0                                  # [F, M]
    cu = jnp.einsum('fmn,fcn->fcm', sim, v_tok,
                    preferred_element_type=jnp.float32)                 # [F, C, M]
    # TODO(synk): pl.reciprocal(denom, approx=True) would use the EUP slot, but the
    # exact divide is kept to stay safely within the 1e-4 comparison tolerance.
    cu = (cu + value_centers) / denom[:, None, :]

    # dispatch back to patches: contraction over M (~4) as an unrolled VPU
    # broadcast-MAC instead of a tiny padded MXU dot.
    patches = cu[:, :, 0:1] * sim[:, 0:1, :]                            # [F, C, N]
    for m in range(1, M):
        patches = patches + cu[:, :, m:m + 1] * sim[:, m:m + 1, :]
    patches = patches.reshape(F, C, w, h)

    # un-fold back to image layout inside VMEM; single full-block store
    out_rows = []
    for f1 in range(fold_w):
        cols = [patches[f1 * fold_h + f2] for f2 in range(fold_h)]
        out_rows.append(cols[0] if fold_h == 1 else jnp.concatenate(cols, axis=2))
    out_img = out_rows[0] if fold_w == 1 else jnp.concatenate(out_rows, axis=1)
    o_ref[0] = out_img.astype(o_ref.dtype)


def cluster_dispatch(ab, pool_t, proj, *, batch, heads, fold_w, fold_h, w, h):
    """proj: [batch*2*heads, head_dim, W0, H0] (per batch element: `heads`
    center slabs followed by `heads` value slabs).  Returns the dispatched
    patches as [batch*heads, head_dim, W0, H0] (image layout)."""
    _, hd, W0, H0 = proj.shape
    N, M = pool_t.shape
    kernel = functools.partial(_cluster_kernel, fold_w=fold_w, fold_h=fold_h,
                               w=w, h=h)
    return pl.pallas_call(
        kernel,
        out_shape=jax.ShapeDtypeStruct((batch * heads, hd, W0, H0), jnp.float32),
        grid=(batch, heads),
        in_specs=[
            pl.BlockSpec(memory_space=pltpu.MemorySpace.SMEM),           # alpha/beta
            pl.BlockSpec((N, M), lambda b, e: (0, 0)),                   # pool^T
            pl.BlockSpec((1, hd, W0, H0),
                         lambda b, e: (b * 2 * heads + e, 0, 0, 0)),         # center
            pl.BlockSpec((1, hd, W0, H0),
                         lambda b, e: (b * 2 * heads + heads + e, 0, 0, 0)),  # value
        ],
        out_specs=pl.BlockSpec((1, hd, W0, H0),
                               lambda b, e: (b * heads + e, 0, 0, 0)),
        compiler_params=pltpu.CompilerParams(
            dimension_semantics=("parallel", "parallel"),
            vmem_limit_bytes=_VMEM_LIMIT),
    )(ab, pool_t, proj, proj)


# ------------------------------ glue / wrapper ------------------------------

@functools.lru_cache(maxsize=None)
def _adaptive_pool_matrix(w, h, pw, ph):
    """[pw*ph, w*h] matrix reproducing nn.AdaptiveAvgPool2d((pw, ph)) on (w, h)."""
    P = np.zeros((pw * ph, w * h), dtype=np.float32)
    for i in range(pw):
        ws, we = (i * w) // pw, -(-((i + 1) * w) // pw)
        for j in range(ph):
            hs, he = (j * h) // ph, -(-((j + 1) * h) // ph)
            cnt = float((we - ws) * (he - hs))
            for iw in range(ws, we):
                for ih in range(hs, he):
                    P[i * ph + j, iw * h + ih] = 1.0 / cnt
    return P


@functools.partial(jax.jit, static_argnames=(
    "heads", "head_dim", "fold_w", "fold_h", "proposal_w", "proposal_h"))
def cluster_forward(x, params, *, heads, head_dim, fold_w, fold_h,
                    proposal_w, proposal_h):
    """x: [B, dim, W0, H0] (NCHW) -> [B, out_dim, W0, H0]."""
    B, dim, W0, H0 = x.shape
    Cd = heads * head_dim
    # The torch module folds only when BOTH fold factors are > 1.
    fw, fh = (fold_w, fold_h) if (fold_w > 1 and fold_h > 1) else (1, 1)
    assert W0 % fw == 0 and H0 % fh == 0
    w, h = W0 // fw, H0 // fh

    # Fused center_proj + patch_proj: one memory-bound pass over x.
    w_cv = jnp.concatenate([params['wc'], params['wp']], axis=0)   # [2*Cd, dim]
    b_cv = jnp.concatenate([params['bc'], params['bp']], axis=0)   # [2*Cd]
    x_flat = x.reshape(B, dim, W0 * H0)
    proj = conv1x1_nchw(x_flat, w_cv, b_cv)                        # [B, 2*Cd, P]

    # Pure (copy-free) reshape only; head/fold regrouping happens in the kernel.
    proj = proj.reshape(B * 2 * heads, head_dim, W0, H0)

    pool_t = jnp.asarray(_adaptive_pool_matrix(w, h, proposal_w, proposal_h).T)
    ab = jnp.stack([params['sim_alpha'].astype(jnp.float32),
                    params['sim_beta'].astype(jnp.float32)])

    patches = cluster_dispatch(ab, pool_t, proj, batch=B, heads=heads,
                               fold_w=fw, fold_h=fh, w=w, h=h)
    # [B*heads, head_dim, W0, H0] -> [B, Cd, P] is again a pure reshape.
    p_flat = patches.reshape(B, Cd, W0 * H0)

    out = conv1x1_nchw(p_flat, params['wo'], params['bo'])
    return out.reshape(B, -1, W0, H0)


# --------------------------- pure-JAX reference -----------------------------

def ref_forward(x, params, *, heads, head_dim, fold_w, fold_h,
                proposal_w, proposal_h):
    B, dim, W0, H0 = x.shape

    def conv1x1(t, wt, bt):
        return jnp.einsum('bcwh,oc->bowh', t, wt) + bt[None, :, None, None]

    value = conv1x1(x, params['wp'], params['bp'])
    xc = conv1x1(x, params['wc'], params['bc'])

    def head_split(t):
        B_, C_, W_, H_ = t.shape
        return t.reshape(B_, heads, C_ // heads, W_, H_).reshape(
            B_ * heads, C_ // heads, W_, H_)

    value, xc = head_split(value), head_split(xc)

    def fold(t):
        B_, C_, W_, H_ = t.shape
        t = t.reshape(B_, C_, fold_w, W_ // fold_w, fold_h, H_ // fold_h)
        t = jnp.transpose(t, (0, 2, 4, 1, 3, 5))
        return t.reshape(B_ * fold_w * fold_h, C_, W_ // fold_w, H_ // fold_h)

    if fold_w > 1 and fold_h > 1:
        value, xc = fold(value), fold(xc)
    b, c, w, h = xc.shape

    def apool(t):
        B_, C_, W_, H_ = t.shape
        rows = []
        for i in range(proposal_w):
            ws, we = (i * W_) // proposal_w, -(-((i + 1) * W_) // proposal_w)
            cols = []
            for j in range(proposal_h):
                hs, he = (j * H_) // proposal_h, -(-((j + 1) * H_) // proposal_h)
                cols.append(jnp.mean(t[:, :, ws:we, hs:he], axis=(2, 3)))
            rows.append(jnp.stack(cols, axis=-1))
        return jnp.stack(rows, axis=-2)  # [B, C, pw, ph]

    centers = apool(xc)
    value_centers = jnp.transpose(apool(value).reshape(b, c, -1), (0, 2, 1))
    cmat = jnp.transpose(centers.reshape(b, c, -1), (0, 2, 1))
    xmat = jnp.transpose(xc.reshape(b, c, -1), (0, 2, 1))

    def l2n(t):
        return t / jnp.maximum(jnp.linalg.norm(t, axis=-1, keepdims=True), 1e-12)

    sim = jax.nn.sigmoid(params['sim_beta'] + params['sim_alpha'] *
                         jnp.einsum('bmc,bnc->bmn', l2n(cmat), l2n(xmat)))
    idx = jnp.argmax(sim, axis=1)
    mask = jax.nn.one_hot(idx, sim.shape[1], axis=1, dtype=sim.dtype)
    sim = sim * mask

    vmat = jnp.transpose(value.reshape(b, c, -1), (0, 2, 1))
    cluster_update = (jnp.einsum('bmn,bnc->bmc', sim, vmat) + value_centers) / (
        jnp.sum(sim, axis=-1, keepdims=True) + 1.0)
    patches = jnp.einsum('bmn,bmc->bnc', sim, cluster_update)
    patches = jnp.transpose(patches, (0, 2, 1)).reshape(b, c, w, h)

    if fold_w > 1 and fold_h > 1:
        B2 = b // (fold_w * fold_h)
        patches = patches.reshape(B2, fold_w, fold_h, c, w, h)
        patches = jnp.transpose(patches, (0, 3, 1, 4, 2, 5)).reshape(
            B2, c, fold_w * w, fold_h * h)
    patches = patches.reshape(patches.shape[0] // heads, heads * c, W0, H0)
    return conv1x1(patches, params['wo'], params['bo'])


# ---------------------------------- main ------------------------------------

if __name__ == "__main__":
    B, dim, W0, H0 = 2, 4, 16, 16
    heads, head_dim = 2, 8
    out_dim = 8
    proposal_w = proposal_h = 2
    Cd = heads * head_dim

    key = jax.random.PRNGKey(0)
    ks = jax.random.split(key, 8)
    params = {
        'wp': jax.random.normal(ks[0], (Cd, dim), jnp.float32) * 0.1,
        'bp': jax.random.normal(ks[1], (Cd,), jnp.float32) * 0.1,
        'wc': jax.random.normal(ks[2], (Cd, dim), jnp.float32) * 0.1,
        'bc': jax.random.normal(ks[3], (Cd,), jnp.float32) * 0.1,
        'wo': jax.random.normal(ks[4], (out_dim, Cd), jnp.float32) * 0.1,
        'bo': jax.random.normal(ks[5], (out_dim,), jnp.float32) * 0.1,
        'sim_alpha': jnp.ones((), jnp.float32),    # nn.Parameter(torch.ones(1))
        'sim_beta': jnp.zeros((), jnp.float32),    # nn.Parameter(torch.zeros(1))
    }
    x = jax.random.normal(ks[6], (B, dim, W0, H0), jnp.float32)

    def run_case(fold_w, fold_h):
        out = cluster_forward(x, params, heads=heads, head_dim=head_dim,
                              fold_w=fold_w, fold_h=fold_h,
                              proposal_w=proposal_w, proposal_h=proposal_h)
        out = jax.block_until_ready(out)
        ref = ref_forward(x, params, heads=heads, head_dim=head_dim,
                          fold_w=fold_w, fold_h=fold_h,
                          proposal_w=proposal_w, proposal_h=proposal_h)
        assert out.shape == (B, out_dim, W0, H0), out.shape
        np.testing.assert_allclose(np.asarray(out), np.asarray(ref),
                                   rtol=1e-4, atol=1e-4)

    run_case(2, 2)   # standard folded configuration
    run_case(2, 1)   # module folds only when BOTH fold factors > 1
    print("KERNEL_OK")
</pallas_src>

<mosaic_0001>
module attributes {stable_mosaic.version = 11 : i64} {
  func.func @_conv1x1_kernel(%arg0: i32, %arg1: i32, %arg2: memref<8x16xf32, #tpu.memory_space<vmem>>, %arg3: memref<8x1xf32, #tpu.memory_space<vmem>>, %arg4: memref<1x16x256xf32, #tpu.memory_space<vmem>>, %arg5: memref<1x8x256xf32, #tpu.memory_space<vmem>>) attributes {dimension_semantics = [#tpu.dimension_semantics<parallel>, #tpu.dimension_semantics<parallel>], iteration_bounds = array<i64: 2, 1>, scalar_prefetch = 0 : i64, scratch_operands = 0 : i64, tpu.core_type = #tpu.core_type<tc>, window_params = [{pipeline_mode = #tpu.pipeline_mode<synchronous>, transform_indices = @transform_0, window_bounds = array<i64: 8, 16>}, {pipeline_mode = #tpu.pipeline_mode<synchronous>, transform_indices = @transform_1, window_bounds = array<i64: 8, 1>}, {transform_indices = @transform_2, window_bounds = array<i64: 1, 16, 256>}, {transform_indices = @transform_3, window_bounds = array<i64: 1, 8, 256>}]} {
    %c0 = arith.constant 0 : index
    %c0_0 = arith.constant 0 : index
    %0 = vector.load %arg2[%c0, %c0_0] : memref<8x16xf32, #tpu.memory_space<vmem>>, vector<8x16xf32>
    %c0_1 = arith.constant 0 : index
    %c0_2 = arith.constant 0 : index
    %c0_3 = arith.constant 0 : index
    %1 = vector.load %arg4[%c0_1, %c0_2, %c0_3] : memref<1x16x256xf32, #tpu.memory_space<vmem>>, vector<1x16x256xf32>
    %2 = vector.shape_cast %1 : vector<1x16x256xf32> to vector<16x256xf32>
    %cst = arith.constant dense<0.000000e+00> : vector<8x256xf32>
    %3 = tpu.matmul %0, %2, %cst {dimension_numbers = #tpu.dot_dimension_numbers<[1], [0], [0], [1], [0, 0, 1, 1], [], []>} : vector<8x16xf32>, vector<16x256xf32>, vector<8x256xf32> -> vector<8x256xf32>
    %c0_4 = arith.constant 0 : index
    %c0_5 = arith.constant 0 : index
    %4 = vector.load %arg3[%c0_4, %c0_5] : memref<8x1xf32, #tpu.memory_space<vmem>>, vector<8x1xf32>
    %5 = vector.broadcast %4 : vector<8x1xf32> to vector<8x256xf32>
    %6 = arith.addf %3, %5 : vector<8x256xf32>
    %c0_6 = arith.constant 0 : index
    %c0_7 = arith.constant 0 : index
    %c0_8 = arith.constant 0 : index
    %7 = vector.load %arg5[%c0_6, %c0_7, %c0_8] : memref<1x8x256xf32, #tpu.memory_space<vmem>>, vector<1x8x256xf32>
    %8 = vector.shape_cast %7 : vector<1x8x256xf32> to vector<8x256xf32>
    %9 = vector.shape_cast %6 : vector<8x256xf32> to vector<1x8x256xf32>
    tpu.vector_store %arg5[%c0_6, %c0_7, %c0_8], %9 {strides = array<i32>} : memref<1x8x256xf32, #tpu.memory_space<vmem>>, vector<1x8x256xf32>,
    return
  }
  func.func @transform_0(%arg0: i32, %arg1: i32) -> (i32, i32) {
    %c0_i32 = arith.constant 0 : i32
    %c0_i32_0 = arith.constant 0 : i32
    %c0_i32_1 = arith.constant 0 : i32
    return %c0_i32, %c0_i32_0 : i32, i32
  }
  func.func @transform_1(%arg0: i32, %arg1: i32) -> (i32, i32) {
    %c0_i32 = arith.constant 0 : i32
    %c0_i32_0 = arith.constant 0 : i32
    %c0_i32_1 = arith.constant 0 : i32
    return %c0_i32, %c0_i32_0 : i32, i32
  }
  func.func @transform_2(%arg0: i32, %arg1: i32) -> (i32, i32, i32) {
    %c0_i32 = arith.constant 0 : i32
    %c0_i32_0 = arith.constant 0 : i32
    return %arg0, %c0_i32, %arg1 : i32, i32, i32
  }
  func.func @transform_3(%arg0: i32, %arg1: i32) -> (i32, i32, i32) {
    %c0_i32 = arith.constant 0 : i32
    %c0_i32_0 = arith.constant 0 : i32
    return %arg0, %c0_i32, %arg1 : i32, i32, i32
  }
}

module attributes {stable_mosaic.version = 11 : i64} {
  func.func @_conv1x1_kernel(%arg0: i32, %arg1: i32, %arg2: memref<32x4xf32, #tpu.memory_space<vmem>>, %arg3: memref<32x1xf32, #tpu.memory_space<vmem>>, %arg4: memref<1x4x256xf32, #tpu.memory_space<vmem>>, %arg5: memref<1x32x256xf32, #tpu.memory_space<vmem>>) attributes {dimension_semantics = [#tpu.dimension_semantics<parallel>, #tpu.dimension_semantics<parallel>], iteration_bounds = array<i64: 2, 1>, scalar_prefetch = 0 : i64, scratch_operands = 0 : i64, tpu.core_type = #tpu.core_type<tc>, window_params = [{pipeline_mode = #tpu.pipeline_mode<synchronous>, transform_indices = @transform_0, window_bounds = array<i64: 32, 4>}, {pipeline_mode = #tpu.pipeline_mode<synchronous>, transform_indices = @transform_1, window_bounds = array<i64: 32, 1>}, {transform_indices = @transform_2, window_bounds = array<i64: 1, 4, 256>}, {transform_indices = @transform_3, window_bounds = array<i64: 1, 32, 256>}]} {
    %c0 = arith.constant 0 : index
    %c0_0 = arith.constant 0 : index
    %0 = vector.load %arg2[%c0, %c0_0] : memref<32x4xf32, #tpu.memory_space<vmem>>, vector<32x4xf32>
    %c0_1 = arith.constant 0 : index
    %c0_2 = arith.constant 0 : index
    %c0_3 = arith.constant 0 : index
    %1 = vector.load %arg4[%c0_1, %c0_2, %c0_3] : memref<1x4x256xf32, #tpu.memory_space<vmem>>, vector<1x4x256xf32>
    %2 = vector.shape_cast %1 : vector<1x4x256xf32> to vector<4x256xf32>
    %cst = arith.constant dense<0.000000e+00> : vector<32x256xf32>
    %3 = tpu.matmul %0, %2, %cst {dimension_numbers = #tpu.dot_dimension_numbers<[1], [0], [0], [1], [0, 0, 1, 1], [], []>} : vector<32x4xf32>, vector<4x256xf32>, vector<32x256xf32> -> vector<32x256xf32>
    %c0_4 = arith.constant 0 : index
    %c0_5 = arith.constant 0 : index
    %4 = vector.load %arg3[%c0_4, %c0_5] : memref<32x1xf32, #tpu.memory_space<vmem>>, vector<32x1xf32>
    %5 = vector.broadcast %4 : vector<32x1xf32> to vector<32x256xf32>
    %6 = arith.addf %3, %5 : vector<32x256xf32>
    %c0_6 = arith.constant 0 : index
    %c0_7 = arith.constant 0 : index
    %c0_8 = arith.constant 0 : index
    %7 = vector.load %arg5[%c0_6, %c0_7, %c0_8] : memref<1x32x256xf32, #tpu.memory_space<vmem>>, vector<1x32x256xf32>
    %8 = vector.shape_cast %7 : vector<1x32x256xf32> to vector<32x256xf32>
    %9 = vector.shape_cast %6 : vector<32x256xf32> to vector<1x32x256xf32>
    tpu.vector_store %arg5[%c0_6, %c0_7, %c0_8], %9 {strides = array<i32>} : memref<1x32x256xf32, #tpu.memory_space<vmem>>, vector<1x32x256xf32>,
    return
  }
  func.func @transform_0(%arg0: i32, %arg1: i32) -> (i32, i32) {
    %c0_i32 = arith.constant 0 : i32
    %c0_i32_0 = arith.constant 0 : i32
    %c0_i32_1 = arith.constant 0 : i32
    return %c0_i32, %c0_i32_0 : i32, i32
  }
  func.func @transform_1(%arg0: i32, %arg1: i32) -> (i32, i32) {
    %c0_i32 = arith.constant 0 : i32
    %c0_i32_0 = arith.constant 0 : i32
    %c0_i32_1 = arith.constant 0 : i32
    return %c0_i32, %c0_i32_0 : i32, i32
  }
  func.func @transform_2(%arg0: i32, %arg1: i32) -> (i32, i32, i32) {
    %c0_i32 = arith.constant 0 : i32
    %c0_i32_0 = arith.constant 0 : i32
    return %arg0, %c0_i32, %arg1 : i32, i32, i32
  }
  func.func @transform_3(%arg0: i32, %arg1: i32) -> (i32, i32, i32) {
    %c0_i32 = arith.constant 0 : i32
    %c0_i32_0 = arith.constant 0 : i32
    return %arg0, %c0_i32, %arg1 : i32, i32, i32
  }
}

module attributes {stable_mosaic.version = 11 : i64} {
  func.func @_cluster_kernel(%arg0: i32, %arg1: i32, %arg2: memref<2xf32, #tpu.memory_space<smem>>, %arg3: memref<64x4xf32, #tpu.memory_space<vmem>>, %arg4: memref<1x8x16x16xf32, #tpu.memory_space<vmem>>, %arg5: memref<1x8x16x16xf32, #tpu.memory_space<vmem>>, %arg6: memref<1x8x16x16xf32, #tpu.memory_space<vmem>>) attributes {dimension_semantics = [#tpu.dimension_semantics<parallel>, #tpu.dimension_semantics<parallel>], iteration_bounds = array<i64: 2, 2>, scalar_prefetch = 0 : i64, scratch_operands = 0 : i64, tpu.core_type = #tpu.core_type<tc>, window_params = [{transform_indices = @transform_0, window_bounds = array<i64: 2>}, {pipeline_mode = #tpu.pipeline_mode<synchronous>, transform_indices = @transform_1, window_bounds = array<i64: 64, 4>}, {transform_indices = @transform_2, window_bounds = array<i64: 1, 8, 16, 16>}, {transform_indices = @transform_3, window_bounds = array<i64: 1, 8, 16, 16>}, {transform_indices = @transform_4, window_bounds = array<i64: 1, 8, 16, 16>}]} {
    %c0 = arith.constant 0 : index
    %0 = memref.load %arg2[%c0] : memref<2xf32, #tpu.memory_space<smem>>
    %c1 = arith.constant 1 : index
    %1 = memref.load %arg2[%c1] : memref<2xf32, #tpu.memory_space<smem>>
    %c0_0 = arith.constant 0 : index
    %c0_1 = arith.constant 0 : index
    %c0_2 = arith.constant 0 : index
    %c0_3 = arith.constant 0 : index
    %2 = vector.load %arg4[%c0_0, %c0_1, %c0_2, %c0_3] : memref<1x8x16x16xf32, #tpu.memory_space<vmem>>, vector<1x8x16x16xf32>
    %3 = vector.shape_cast %2 : vector<1x8x16x16xf32> to vector<8x16x16xf32>
    %c0_4 = arith.constant 0 : index
    %c0_5 = arith.constant 0 : index
    %c0_6 = arith.constant 0 : index
    %c0_7 = arith.constant 0 : index
    %4 = vector.load %arg5[%c0_4, %c0_5, %c0_6, %c0_7] : memref<1x8x16x16xf32, #tpu.memory_space<vmem>>, vector<1x8x16x16xf32>
    %5 = vector.shape_cast %4 : vector<1x8x16x16xf32> to vector<8x16x16xf32>
    %6 = vector.extract_strided_slice %3 {offsets = [0, 0, 0], sizes = [8, 8, 8], strides = [1, 1, 1]} : vector<8x16x16xf32> to vector<8x8x8xf32>
    %7 = vector.extract_strided_slice %5 {offsets = [0, 0, 0], sizes = [8, 8, 8], strides = [1, 1, 1]} : vector<8x16x16xf32> to vector<8x8x8xf32>
    %8 = vector.extract_strided_slice %3 {offsets = [0, 0, 8], sizes = [8, 8, 8], strides = [1, 1, 1]} : vector<8x16x16xf32> to vector<8x8x8xf32>
    %9 = vector.extract_strided_slice %5 {offsets = [0, 0, 8], sizes = [8, 8, 8], strides = [1, 1, 1]} : vector<8x16x16xf32> to vector<8x8x8xf32>
    %10 = vector.extract_strided_slice %3 {offsets = [0, 8, 0], sizes = [8, 8, 8], strides = [1, 1, 1]} : vector<8x16x16xf32> to vector<8x8x8xf32>
    %11 = vector.extract_strided_slice %5 {offsets = [0, 8, 0], sizes = [8, 8, 8], strides = [1, 1, 1]} : vector<8x16x16xf32> to vector<8x8x8xf32>
    %12 = vector.extract_strided_slice %3 {offsets = [0, 8, 8], sizes = [8, 8, 8], strides = [1, 1, 1]} : vector<8x16x16xf32> to vector<8x8x8xf32>
    %13 = vector.extract_strided_slice %5 {offsets = [0, 8, 8], sizes = [8, 8, 8], strides = [1, 1, 1]} : vector<8x16x16xf32> to vector<8x8x8xf32>
    %14 = vector.shape_cast %6 : vector<8x8x8xf32> to vector<1x8x8x8xf32>
    %15 = vector.shape_cast %8 : vector<8x8x8xf32> to vector<1x8x8x8xf32>
    %16 = vector.shape_cast %10 : vector<8x8x8xf32> to vector<1x8x8x8xf32>
    %17 = vector.shape_cast %12 : vector<8x8x8xf32> to vector<1x8x8x8xf32>
    %18 = tpu.concatenate %14, %15, %16, %17 in 0 : vector<1x8x8x8xf32>, vector<1x8x8x8xf32>, vector<1x8x8x8xf32>, vector<1x8x8x8xf32> -> vector<4x8x8x8xf32>
    %19 = vector.shape_cast %18 : vector<4x8x8x8xf32> to vector<4x8x64xf32>
    %20 = vector.shape_cast %7 : vector<8x8x8xf32> to vector<1x8x8x8xf32>
    %21 = vector.shape_cast %9 : vector<8x8x8xf32> to vector<1x8x8x8xf32>
    %22 = vector.shape_cast %11 : vector<8x8x8xf32> to vector<1x8x8x8xf32>
    %23 = vector.shape_cast %13 : vector<8x8x8xf32> to vector<1x8x8x8xf32>
    %24 = tpu.concatenate %20, %21, %22, %23 in 0 : vector<1x8x8x8xf32>, vector<1x8x8x8xf32>, vector<1x8x8x8xf32>, vector<1x8x8x8xf32> -> vector<4x8x8x8xf32>
    %25 = vector.shape_cast %24 : vector<4x8x8x8xf32> to vector<4x8x64xf32>
    %c0_8 = arith.constant 0 : index
    %c0_9 = arith.constant 0 : index
    %26 = vector.load %arg3[%c0_8, %c0_9] : memref<64x4xf32, #tpu.memory_space<vmem>>, vector<64x4xf32>
    %27 = vector.shape_cast %19 : vector<4x8x64xf32> to vector<32x64xf32>
    %cst = arith.constant dense<0.000000e+00> : vector<32x4xf32>
    %28 = tpu.matmul %27, %26, %cst {dimension_numbers = #tpu.dot_dimension_numbers<[1], [0], [0], [1], [0, 0, 1, 1], [], []>} : vector<32x64xf32>, vector<64x4xf32>, vector<32x4xf32> -> vector<32x4xf32>
    %29 = vector.shape_cast %28 : vector<32x4xf32> to vector<4x8x4xf32>
    %30 = vector.shape_cast %25 : vector<4x8x64xf32> to vector<32x64xf32>
    %cst_10 = arith.constant dense<0.000000e+00> : vector<32x4xf32>
    %31 = tpu.matmul %30, %26, %cst_10 {dimension_numbers = #tpu.dot_dimension_numbers<[1], [0], [0], [1], [0, 0, 1, 1], [], []>} : vector<32x64xf32>, vector<64x4xf32>, vector<32x4xf32> -> vector<32x4xf32>
    %32 = vector.shape_cast %31 : vector<32x4xf32> to vector<4x8x4xf32>
    %33 = arith.mulf %19, %19 : vector<4x8x64xf32>
    %cst_11 = arith.constant dense<0.000000e+00> : vector<4x64xf32>
    %34 = vector.multi_reduction <add>, %33, %cst_11 [1] : vector<4x8x64xf32> to vector<4x64xf32>
    %35 = vector.shape_cast %34 : vector<4x64xf32> to vector<4x1x64xf32>
    %cst_12 = arith.constant 1.000000e-24 : f32
    %36 = vector.broadcast %cst_12 : f32 to vector<4x1x64xf32>
    %37 = arith.maximumf %35, %36 : vector<4x1x64xf32>
    %38 = math.rsqrt %37 : vector<4x1x64xf32>
    %39 = vector.broadcast %38 : vector<4x1x64xf32> to vector<4x8x64xf32>
    %40 = arith.mulf %19, %39 : vector<4x8x64xf32>
    %41 = arith.mulf %29, %29 : vector<4x8x4xf32>
    %cst_13 = arith.constant dense<0.000000e+00> : vector<4x4xf32>
    %42 = vector.multi_reduction <add>, %41, %cst_13 [1] : vector<4x8x4xf32> to vector<4x4xf32>
    %43 = vector.shape_cast %42 : vector<4x4xf32> to vector<4x1x4xf32>
    %cst_14 = arith.constant 1.000000e-24 : f32
    %44 = vector.broadcast %cst_14 : f32 to vector<4x1x4xf32>
    %45 = arith.maximumf %43, %44 : vector<4x1x4xf32>
    %46 = math.rsqrt %45 : vector<4x1x4xf32>
    %47 = vector.broadcast %46 : vector<4x1x4xf32> to vector<4x8x4xf32>
    %48 = arith.mulf %29, %47 : vector<4x8x4xf32>
    "tpu.trace_start"() <{level = 10 : i32, message = "fcm,fcn->fmn"}> : () -> ()
    %cst_15 = arith.constant dense<0.000000e+00> : vector<4x4x64xf32>
    %49 = tpu.matmul %48, %40, %cst_15 {dimension_numbers = #tpu.dot_dimension_numbers<[1], [1], [2], [2], [0, 0, 0, 2, 1, 2], [0], [0]>} : vector<4x8x4xf32>, vector<4x8x64xf32>, vector<4x4x64xf32> -> vector<4x4x64xf32>
    "tpu.trace_stop"() : () -> ()
    %50 = vector.broadcast %0 : f32 to vector<4x4x64xf32>
    %51 = arith.mulf %50, %49 : vector<4x4x64xf32>
    %52 = vector.broadcast %1 : f32 to vector<4x4x64xf32>
    %53 = arith.addf %52, %51 : vector<4x4x64xf32>
    %54 = arith.negf %53 : vector<4x4x64xf32>
    %55 = math.exp %54 : vector<4x4x64xf32>
    %cst_16 = arith.constant 1.000000e+00 : f32
    %56 = vector.broadcast %cst_16 : f32 to vector<4x4x64xf32>
    %57 = arith.addf %56, %55 : vector<4x4x64xf32>
    %58 = arith.divf %56, %57 : vector<4x4x64xf32>
    %59 = tpu.iota {dimensions = array<i32: 1>} : vector<4x4x64xi32>
    %cst_17 = arith.constant dense<0xFF800000> : vector<4x64xf32>
    %60 = vector.multi_reduction <maximumf>, %58, %cst_17 [1] : vector<4x4x64xf32> to vector<4x64xf32>
    %61 = vector.shape_cast %60 : vector<4x64xf32> to vector<4x1x64xf32>
    %62 = vector.broadcast %61 : vector<4x1x64xf32> to vector<4x4x64xf32>
    %63 = arith.cmpf oeq, %58, %62 : vector<4x4x64xf32>
    %c4_i32 = arith.constant 4 : i32
    %64 = vector.broadcast %c4_i32 : i32 to vector<4x4x64xi32>
    %65 = arith.select %63, %59, %64 : vector<4x4x64xi1>, vector<4x4x64xi32>
    %cst_18 = arith.constant dense<2147483647> : vector<4x64xi32>
    %66 = vector.multi_reduction <minsi>, %65, %cst_18 [1] : vector<4x4x64xi32> to vector<4x64xi32>
    %67 = vector.shape_cast %66 : vector<4x64xi32> to vector<4x1x64xi32>
    %68 = vector.broadcast %67 : vector<4x1x64xi32> to vector<4x4x64xi32>
    %69 = arith.cmpi eq, %59, %68 : vector<4x4x64xi32>
    %cst_19 = arith.constant 0.000000e+00 : f32
    %70 = vector.broadcast %cst_19 : f32 to vector<4x4x64xf32>
    %71 = arith.select %69, %58, %70 : vector<4x4x64xi1>, vector<4x4x64xf32>
    %cst_20 = arith.constant dense<0.000000e+00> : vector<4x4xf32>
    %72 = vector.multi_reduction <add>, %71, %cst_20 [2] : vector<4x4x64xf32> to vector<4x4xf32>
    %cst_21 = arith.constant 1.000000e+00 : f32
    %73 = vector.broadcast %cst_21 : f32 to vector<4x4xf32>
    %74 = arith.addf %72, %73 : vector<4x4xf32>
    "tpu.trace_start"() <{level = 10 : i32, message = "fmn,fcn->fcm"}> : () -> ()
    %cst_22 = arith.constant dense<0.000000e+00> : vector<4x8x4xf32>
    %75 = tpu.matmul %25, %71, %cst_22 {dimension_numbers = #tpu.dot_dimension_numbers<[2], [2], [1], [1], [0, 0, 0, 1, 1, 1], [0], [0]>} : vector<4x8x64xf32>, vector<4x4x64xf32>, vector<4x8x4xf32> -> vector<4x8x4xf32>
    "tpu.trace_stop"() : () -> ()
    %76 = arith.addf %75, %32 : vector<4x8x4xf32>
    %77 = vector.shape_cast %74 : vector<4x4xf32> to vector<4x1x4xf32>
    %78 = vector.broadcast %77 : vector<4x1x4xf32> to vector<4x8x4xf32>
    %79 = arith.divf %76, %78 : vector<4x8x4xf32>
    %80 = vector.extract_strided_slice %79 {offsets = [0, 0, 0], sizes = [4, 8, 1], strides = [1, 1, 1]} : vector<4x8x4xf32> to vector<4x8x1xf32>
    %81 = vector.extract_strided_slice %71 {offsets = [0, 0, 0], sizes = [4, 1, 64], strides = [1, 1, 1]} : vector<4x4x64xf32> to vector<4x1x64xf32>
    %82 = vector.broadcast %80 : vector<4x8x1xf32> to vector<4x8x64xf32>
    %83 = vector.broadcast %81 : vector<4x1x64xf32> to vector<4x8x64xf32>
    %84 = arith.mulf %82, %83 : vector<4x8x64xf32>
    %85 = vector.extract_strided_slice %79 {offsets = [0, 0, 1], sizes = [4, 8, 1], strides = [1, 1, 1]} : vector<4x8x4xf32> to vector<4x8x1xf32>
    %86 = vector.extract_strided_slice %71 {offsets = [0, 1, 0], sizes = [4, 1, 64], strides = [1, 1, 1]} : vector<4x4x64xf32> to vector<4x1x64xf32>
    %87 = vector.broadcast %85 : vector<4x8x1xf32> to vector<4x8x64xf32>
    %88 = vector.broadcast %86 : vector<4x1x64xf32> to vector<4x8x64xf32>
    %89 = arith.mulf %87, %88 : vector<4x8x64xf32>
    %90 = arith.addf %84, %89 : vector<4x8x64xf32>
    %91 = vector.extract_strided_slice %79 {offsets = [0, 0, 2], sizes = [4, 8, 1], strides = [1, 1, 1]} : vector<4x8x4xf32> to vector<4x8x1xf32>
    %92 = vector.extract_strided_slice %71 {offsets = [0, 2, 0], sizes = [4, 1, 64], strides = [1, 1, 1]} : vector<4x4x64xf32> to vector<4x1x64xf32>
    %93 = vector.broadcast %91 : vector<4x8x1xf32> to vector<4x8x64xf32>
    %94 = vector.broadcast %92 : vector<4x1x64xf32> to vector<4x8x64xf32>
    %95 = arith.mulf %93, %94 : vector<4x8x64xf32>
    %96 = arith.addf %90, %95 : vector<4x8x64xf32>
    %97 = vector.extract_strided_slice %79 {offsets = [0, 0, 3], sizes = [4, 8, 1], strides = [1, 1, 1]} : vector<4x8x4xf32> to vector<4x8x1xf32>
    %98 = vector.extract_strided_slice %71 {offsets = [0, 3, 0], sizes = [4, 1, 64], strides = [1, 1, 1]} : vector<4x4x64xf32> to vector<4x1x64xf32>
    %99 = vector.broadcast %97 : vector<4x8x1xf32> to vector<4x8x64xf32>
    %100 = vector.broadcast %98 : vector<4x1x64xf32> to vector<4x8x64xf32>
    %101 = arith.mulf %99, %100 : vector<4x8x64xf32>
    %102 = arith.addf %96, %101 : vector<4x8x64xf32>
    %103 = vector.shape_cast %102 : vector<4x8x64xf32> to vector<4x8x8x8xf32>
    %104 = vector.extract_strided_slice %103 {offsets = [0, 0, 0, 0], sizes = [1, 8, 8, 8], strides = [1, 1, 1, 1]} : vector<4x8x8x8xf32> to vector<1x8x8x8xf32>
    %105 = vector.shape_cast %104 : vector<1x8x8x8xf32> to vector<8x8x8xf32>
    %106 = vector.extract_strided_slice %103 {offsets = [1, 0, 0, 0], sizes = [1, 8, 8, 8], strides = [1, 1, 1, 1]} : vector<4x8x8x8xf32> to vector<1x8x8x8xf32>
    %107 = vector.shape_cast %106 : vector<1x8x8x8xf32> to vector<8x8x8xf32>
    %108 = tpu.concatenate %105, %107 in 2 : vector<8x8x8xf32>, vector<8x8x8xf32> -> vector<8x8x16xf32>
    %109 = vector.extract_strided_slice %103 {offsets = [2, 0, 0, 0], sizes = [1, 8, 8, 8], strides = [1, 1, 1, 1]} : vector<4x8x8x8xf32> to vector<1x8x8x8xf32>
    %110 = vector.shape_cast %109 : vector<1x8x8x8xf32> to vector<8x8x8xf32>
    %111 = vector.extract_strided_slice %103 {offsets = [3, 0, 0, 0], sizes = [1, 8, 8, 8], strides = [1, 1, 1, 1]} : vector<4x8x8x8xf32> to vector<1x8x8x8xf32>
    %112 = vector.shape_cast %111 : vector<1x8x8x8xf32> to vector<8x8x8xf32>
    %113 = tpu.concatenate %110, %112 in 2 : vector<8x8x8xf32>, vector<8x8x8xf32> -> vector<8x8x16xf32>
    %114 = tpu.concatenate %108, %113 in 1 : vector<8x8x16xf32>, vector<8x8x16xf32> -> vector<8x16x16xf32>
    %c0_23 = arith.constant 0 : index
    %c0_24 = arith.constant 0 : index
    %c0_25 = arith.constant 0 : index
    %c0_26 = arith.constant 0 : index
    %115 = vector.load %arg6[%c0_23, %c0_24, %c0_25, %c0_26] : memref<1x8x16x16xf32, #tpu.memory_space<vmem>>, vector<1x8x16x16xf32>
    %116 = vector.shape_cast %115 : vector<1x8x16x16xf32> to vector<8x16x16xf32>
    %117 = vector.shape_cast %114 : vector<8x16x16xf32> to vector<1x8x16x16xf32>
    tpu.vector_store %arg6[%c0_23, %c0_24, %c0_25, %c0_26], %117 {strides = array<i32>} : memref<1x8x16x16xf32, #tpu.memory_space<vmem>>, vector<1x8x16x16xf32>,
    return
  }
  func.func @transform_0(%arg0: i32, %arg1: i32) -> i32 {
    %c0_i32 = arith.constant 0 : i32
    %c0_i32_0 = arith.constant 0 : i32
    return %c0_i32 : i32
  }
  func.func @transform_1(%arg0: i32, %arg1: i32) -> (i32, i32) {
    %c0_i32 = arith.constant 0 : i32
    %c0_i32_0 = arith.constant 0 : i32
    %c0_i32_1 = arith.constant 0 : i32
    return %c0_i32, %c0_i32_0 : i32, i32
  }
  func.func @transform_2(%arg0: i32, %arg1: i32) -> (i32, i32, i32, i32) {
    %c2_i32 = arith.constant 2 : i32
    %0 = arith.muli %arg0, %c2_i32 : i32
    %c2_i32_0 = arith.constant 2 : i32
    %1 = arith.muli %0, %c2_i32_0 : i32
    %2 = arith.addi %1, %arg1 : i32
    %c0_i32 = arith.constant 0 : i32
    %c0_i32_1 = arith.constant 0 : i32
    %c0_i32_2 = arith.constant 0 : i32
    %c0_i32_3 = arith.constant 0 : i32
    return %2, %c0_i32, %c0_i32_1, %c0_i32_2 : i32, i32, i32, i32
  }
  func.func @transform_3(%arg0: i32, %arg1: i32) -> (i32, i32, i32, i32) {
    %c2_i32 = arith.constant 2 : i32
    %0 = arith.muli %arg0, %c2_i32 : i32
    %c2_i32_0 = arith.constant 2 : i32
    %1 = arith.muli %0, %c2_i32_0 : i32
    %c2_i32_1 = arith.constant 2 : i32
    %2 = arith.addi %1, %c2_i32_1 : i32
    %3 = arith.addi %2, %arg1 : i32
    %c0_i32 = arith.constant 0 : i32
    %c0_i32_2 = arith.constant 0 : i32
    %c0_i32_3 = arith.constant 0 : i32
    %c0_i32_4 = arith.constant 0 : i32
    return %3, %c0_i32, %c0_i32_2, %c0_i32_3 : i32, i32, i32, i32
  }
  func.func @transform_4(%arg0: i32, %arg1: i32) -> (i32, i32, i32, i32) {
    %c2_i32 = arith.constant 2 : i32
    %0 = arith.muli %arg0, %c2_i32 : i32
    %1 = arith.addi %0, %arg1 : i32
    %c0_i32 = arith.constant 0 : i32
    %c0_i32_0 = arith.constant 0 : i32
    %c0_i32_1 = arith.constant 0 : i32
    %c0_i32_2 = arith.constant 0 : i32
    return %1, %c0_i32, %c0_i32_0, %c0_i32_1 : i32, i32, i32, i32
  }
}

</mosaic_0001>

<bundles_post_ra>
// kernel: cluster_forward.3
= control target key start
LH: loop header
LB: loop body
LE: loop exit
PB: predicated region body
PF: predicated region fallthrough
CT: control target
= control target key end

     0   :  { %s539_s12 = smov 0   ;;  %s541_s13 = smov 0   ;;  %s600_s0 = inlined_call_operand.vmem [shape: f32[32,4], index: 0, kind: input, shape index: {}]   ;;  %s601_s1 = inlined_call_operand.vmem [shape: f32[32,1], index: 1, kind: input, shape index: {}]   ;;  %s602_s2 = inlined_call_operand.vmem [shape: f32[2,4,256], index: 2, kind: input, shape index: {}]   ;;  %s603_s3 = inlined_call_operand.vmem [shape: f32[2,32,256], index: 3, kind: output, shape index: {}]  }
   0x1   :  { %s543_s14 = smov 0  }
   0x2 LB: > { %s25_s15 = sadd.s32 1, %s511_s13  ;;  %p447_p0 = scmp.ge.s32.totalorder %s515_s14, 1  ;;  %s515_s14 = sphi %s543_s14, %s13_s14   ;;  %s511_s13 = sphi %s541_s13, %s605_s13   ;;  %s507_s12 = sphi %s539_s12, %s604_s12  }
   0x3   : > { %p27_p1 = scmp.ge.s32.totalorder %s25_s15, 2  ;;  %p158_p2 = scmp.lt.s32.totalorder %s515_s14, 3 }
   0x5   : > { %s607_s15 = smov (%p27_p1, %s25_s15), 0  ;;  %p159_p3 = pnand %p447_p0, %p158_p2 }
   0x6   : > { %p191_p4 = scmp.lt.s32.totalorder (!%p159_p3), %s507_s12, 1  ;;  %v517_v0 = vmov (!%p159_p3), 0.0   ;;  %v217_v1 = vld [vmem:[%s601_s1 + $0x10] sm:$0xff] (!%p159_p3)  ;;  %v518_v2 = vmov (!%p159_p3), 0   ;;  %v215_v3 = vld [vmem:[%s601_s1] sm:$0xff] (!%p159_p3)  ;;  %v218_v4 = vld [vmem:[%s601_s1 + $0x18] sm:$0xff] (!%p159_p3) }
   0x7   : > { %162 = sbr.rel (%p159_p3) target bundleno = 242 (0xf2), region = 32  ;;  %323 = vmatprep.mubr.f32.mxu0 (!%p159_p3), %v517_v0  ;;  %335 = vmatprep.mubr.f32.mxu1 (!%p159_p3), %v517_v0  ;;  %v216_v5 = vld [vmem:[%s601_s1 + $0x8] sm:$0xff] (!%p159_p3)  ;;  %vm254_vm0 = vcmask (!%p159_p3), 1043456   ;;  %v210_v8 = vld [vmem:[%s600_s0] sm:$0xff] (!%p159_p3)  ;;  %vm241_vm1 = vcmask (!%p159_p3), 31744   ;;  %v212_v9 = vld [vmem:[%s600_s0 + $0x10] sm:$0xff] (!%p159_p3) }
   0x8   : > { %491 = vset.pattern.permute.xlu1 (!%p159_p3), %v518_v2  ;;  %490 = vset.pattern.permute.xlu0 (!%p159_p3), %v518_v2  ;;  %v211_v10 = vld [vmem:[%s600_s0 + $0x8] sm:$0xff] (!%p159_p3)  ;;  %v213_v11 = vld [vmem:[%s600_s0 + $0x18] sm:$0xff] (!%p159_p3) }
   0x9   : > { %231 = vperm.xlu1 (!%p159_p3), %491, %v217_v1   ;;  %221 = vperm.xlu0 (!%p159_p3), %490, %v215_v3  }
   0xd   : > { %236 = vperm.xlu1 (!%p159_p3), %491, %v218_v4   ;;  %226 = vperm.xlu0 (!%p159_p3), %490, %v216_v5  }
   0xe   : > { %s609_s12 = smov (!%p191_p4, %s507_s12), 1 }
   0xf   : > { %s460_s20 = sshll.u32 %s609_s12, 3  ;;  %s461_s9 = sshll.u32 %s609_s12, 6 }
  0x10   : > { %s198_s27 = scalar_lea.vmem %s602_s2, %s460_s20  ;;  %s208_s16 = scalar_lea.vmem %s603_s3, %s461_s9 }
  0x11   : > { %v214_v6 = vld [vmem:[%s198_s27] sm:$0xff] }
  0x12   : > { %v240_v7 = vcombine.high %v214_v6, %v214_v6 }
  0x14   : > { %452 = vmatprep.subr.msk.mxu0 %vm254_vm0, %v240_v7  ;;  %462 = vmatprep.subr.msk.mxu1 %vm254_vm0, %v240_v7 }
  0x15   : > { %453 = vmatpush1.msk.msra.mxu0 %vm254_vm0, %v214_v6  ;;  %463 = vmatpush1.msk.msra.mxu1 %vm254_vm0, %v214_v6 }
  0x16   : > { %454 = vmatmul.mubr.msk.f32.vlgmr.msra.gmra.mrb[0].mxu0 %vm241_vm1, %v210_v8  ;;  %456 = vmatmul.mubr.msk.f32.vlgmr.msra.gmra.mrb[0].mxu1 %vm241_vm1, %v212_v9 }
  0x17   : > { %329 = vmatprep.mubr.f32.mxu0 %v517_v0  ;;  %341 = vmatprep.mubr.f32.mxu1 %v517_v0 }
  0x1a   : > { %455 = vmatmul.mubr.msk.f32.gmra.mrb[2].mxu0 %vm241_vm1, %v211_v10  ;;  %457 = vmatmul.mubr.msk.f32.gmra.mrb[2].mxu1 %vm241_vm1, %v213_v11 }
  0x88   : > { %v232_v12 = vpop.permute.xlu1 %231  ;;  %v222_v13 = vpop.permute.xlu0 %221 }
  0x8c   : > { %v237_v22 = vpop.permute.xlu1 %236  ;;  %v227_v23 = vpop.permute.xlu0 %226 }
  0xe9   : > { %v325_v14 = vpop.f32.mrb[0].mxu0  ;;  %v337_v15 = vpop.f32.mrb[0].mxu1 }
  0xea   : > { %v326_v16 = vadd.f32 %v325_v14, %v222_v13  ;;  %v338_v17 = vadd.f32 %v337_v15, %v232_v12  ;;  %v327_v18 = vpop.f32.mrb[1].mxu0  ;;  %v339_v19 = vpop.f32.mrb[1].mxu1 }
  0xeb   : > { %v328_v20 = vadd.f32 %v327_v18, %v222_v13  ;;  %v340_v21 = vadd.f32 %v339_v19, %v232_v12 }
  0xec   : > { %348 = vst [vmem:[%s208_s16] sm:$0xff] %v326_v16  ;;  %352 = vst [vmem:[%s208_s16 + $0x20] sm:$0xff] %v338_v17 }
  0xed   : > { %349 = vst [vmem:[%s208_s16 + $0x8] sm:$0xff] %v328_v20  ;;  %353 = vst [vmem:[%s208_s16 + $0x28] sm:$0xff] %v340_v21  ;;  %v331_v24 = vpop.f32.mrb[2].mxu0  ;;  %v343_v25 = vpop.f32.mrb[2].mxu1 }
  0xee   : > { %v332_v26 = vadd.f32 %v331_v24, %v227_v23  ;;  %v344_v27 = vadd.f32 %v343_v25, %v237_v22  ;;  %v333_v28 = vpop.f32.mrb[3].mxu0  ;;  %v345_v29 = vpop.f32.mrb[3].mxu1 }
  0xef   : > { %v334_v30 = vadd.f32 %v333_v28, %v227_v23  ;;  %v346_v31 = vadd.f32 %v345_v29, %v237_v22 }
  0xf0   : > { %350 = vst [vmem:[%s208_s16 + $0x10] sm:$0xff] %v332_v26  ;;  %354 = vst [vmem:[%s208_s16 + $0x30] sm:$0xff] %v344_v27 }
  0xf1   : > { %351 = vst [vmem:[%s208_s16 + $0x18] sm:$0xff] %v334_v30  ;;  %355 = vst [vmem:[%s208_s16 + $0x38] sm:$0xff] %v346_v31 }
  0xf2 PF: > { %s13_s14 = sadd.s32 1, %s515_s14   ;;  %s604_s12 = smov %s511_s13 }
  0xf3   : > { %p10_p5 = scmp.ge.s32.totalorder %s13_s14, 4   ;;  %s605_s13 = smov %s607_s15 }
  0xf5   :  { %12 = sbr.rel (!%p10_p5) target bundleno = 2 (0x2), region = 62 }

// kernel: cluster_forward.5
= control target key start
LH: loop header
LB: loop body
LE: loop exit
PB: predicated region body
PF: predicated region fallthrough
CT: control target
= control target key end

     0   :  { %s476_s12 = smov 0   ;;  %s478_s13 = smov 0   ;;  %s515_s0 = inlined_call_operand.vmem [shape: f32[8,16], index: 0, kind: input, shape index: {}]   ;;  %s516_s1 = inlined_call_operand.vmem [shape: f32[8,1], index: 1, kind: input, shape index: {}]   ;;  %s517_s2 = inlined_call_operand.vmem [shape: f32[2,16,256], index: 2, kind: input, shape index: {}]   ;;  %s518_s3 = inlined_call_operand.vmem [shape: f32[2,8,256], index: 3, kind: output, shape index: {}]  }
   0x1   :  { %s480_s14 = smov 0  }
   0x2 LB: > { %s25_s15 = sadd.s32 1, %s448_s13  ;;  %p389_p0 = scmp.ge.s32.totalorder %s452_s14, 1  ;;  %s452_s14 = sphi %s480_s14, %s13_s14   ;;  %s448_s13 = sphi %s478_s13, %s520_s13   ;;  %s444_s12 = sphi %s476_s12, %s519_s12  }
   0x3   : > { %p27_p1 = scmp.ge.s32.totalorder %s25_s15, 2  ;;  %p158_p2 = scmp.lt.s32.totalorder %s452_s14, 3 }
   0x5   : > { %s522_s15 = smov (%p27_p1, %s25_s15), 0  ;;  %p159_p3 = pnand %p389_p0, %p158_p2 }
   0x6   : > { %p191_p4 = scmp.lt.s32.totalorder (!%p159_p3), %s444_s12, 1  ;;  %v215_v0 = vld [vmem:[%s516_s1] sm:$0xff] (!%p159_p3)  ;;  %v454_v1 = vmov (!%p159_p3), 0.0   ;;  %v455_v2 = vmov (!%p159_p3), 0   ;;  %vm221_vm0 = vcmask (!%p159_p3), 130048  }
   0x7   : > { %162 = sbr.rel (%p159_p3) target bundleno = 240 (0xf0), region = 32  ;;  %289 = vmatprep.mubr.f32.mxu0 (!%p159_p3), %v454_v1  ;;  %429 = vset.pattern.permute.xlu0 (!%p159_p3), %v455_v2  ;;  %v210_v9 = vld [vmem:[%s515_s0] sm:$0xff] (!%p159_p3) }
   0x8   : > { %218 = vperm.xlu0 (!%p159_p3), %429, %v215_v0  }
   0xe   : > { %s524_s12 = smov (!%p191_p4, %s444_s12), 1 }
   0xf   : > { %s397_s18 = sshll.u32 %s524_s12, 5  ;;  %s398_s24 = sshll.u32 %s524_s12, 4 }
  0x10   : > { %s198_s21 = scalar_lea.vmem %s517_s2, %s397_s18  ;;  %s208_s27 = scalar_lea.vmem %s518_s3, %s398_s24 }
  0x11   : > { %v212_v3 = vld [vmem:[%s198_s21 + $0x8] sm:$0xff]  ;;  %v214_v4 = vld [vmem:[%s198_s21 + $0x18] sm:$0xff]  ;;  %v211_v5 = vld [vmem:[%s198_s21] sm:$0xff] }
  0x12   : > { %v399_v6 = vpack.c.bf16 %v214_v4, %v212_v3  ;;  %v213_v7 = vld [vmem:[%s198_s21 + $0x10] sm:$0xff] }
  0x13   : > { %v401_v8 = vpack.c.bf16 %v213_v7, %v211_v5 }
  0x14   : > { %400 = vmatprep.subr.bf16.mxu0 %v399_v6 }
  0x15   : > { %402 = vmatpush1.bf16.msra.mxu0 %v401_v8 }
  0x18   : > { %394 = vmatmul.mubr.msk.f32.vlgmr.msra.gmra.mrb[0].mxu0 %vm221_vm0, %v210_v9 }
  0x87   : > { %v219_v10 = vpop.permute.xlu0 %218 }
  0xeb   : > { %v291_v11 = vpop.f32.mrb[0].mxu0 }
  0xec   : > { %v292_v12 = vadd.f32 %v291_v11, %v219_v10  ;;  %v293_v13 = vpop.f32.mrb[1].mxu0 }
  0xed   : > { %v294_v14 = vadd.f32 %v293_v13, %v219_v10 }
  0xee   : > { %296 = vst [vmem:[%s208_s27] sm:$0xff] %v292_v12 }
  0xef   : > { %297 = vst [vmem:[%s208_s27 + $0x8] sm:$0xff] %v294_v14 }
  0xf0 PF: > { %s13_s14 = sadd.s32 1, %s452_s14   ;;  %s519_s12 = smov %s448_s13 }
  0xf1   : > { %p10_p5 = scmp.ge.s32.totalorder %s13_s14, 4   ;;  %s520_s13 = smov %s522_s15 }
  0xf3   :  { %12 = sbr.rel (!%p10_p5) target bundleno = 2 (0x2), region = 62 }

// kernel: cluster_forward.4
= control target key start
LH: loop header
LB: loop body
LE: loop exit
PB: predicated region body
PF: predicated region fallthrough
CT: control target
= control target key end

     0   :  { %9 = vsyncpa [#allocation3], 0  ;;  %s4461_s15 = smov 0   ;;  %s4463_s16 = smov 0   ;;  %s5651_s0 = inlined_call_operand.vmem [shape: f32[2], index: 0, kind: input, shape index: {}]   ;;  %s5652_s1 = inlined_call_operand.vmem [shape: f32[64,4], index: 1, kind: input, shape index: {}]   ;;  %s5653_s2 = inlined_call_operand.vmem [shape: f32[8,8,16,16], index: 2, kind: input, shape index: {}, may-alias: {2,3}]   ;;  %s5654_s3 = inlined_call_operand.vmem [shape: f32[8,8,16,16], index: 3, kind: input, shape index: {}, may-alias: {2,3}]   ;;  %s5655_s4 = inlined_call_operand.vmem [shape: f32[4,8,16,16], index: 4, kind: output, shape index: {}]  }
   0x1   :  { %s4465_s17 = smov 0   ;;  %s4467_s18 = smov 0  }
   0x2   :  { %s4469_s19 = smov 0  }
   0x3 LB: > { %s4016_s20 = sadd.s32 4294967295, %s4411_s19   ;;  %s24_s21 = sadd.s32 1, %s4403_s17  ;;  %s4411_s19 = sphi %s4469_s19, %s15_s19   ;;  %s4407_s18 = sphi %s4467_s18, %s5661_s18   ;;  %s4403_s17 = sphi %s4465_s17, %s5660_s17   ;;  %s4399_s16 = sphi %s4463_s16, %s5659_s16   ;;  %s4395_s15 = sphi %s4461_s15, %s5658_s15  }
   0x4   : > { %p25_p0 = scmp.ge.s32.totalorder %s24_s21, 2  ;;  %s27_s22 = sadd.s32 1, %s4407_s18 }
   0x5   : > { %p4024_p1 = scmp.ge.s32.totalorder %s4411_s19, 1  ;;  %p166_p2 = scmp.lt.s32.totalorder %s4411_s19, 5 }
   0x6   : > { %s5663_s21 = smov (%p25_p0, %s24_s21), 0  ;;  %s5665_s22 = smov (!%p25_p0, %s27_s22), %s4407_s18 }
   0x7   : > { %p4494_p3 = pnand %p4024_p1, %p166_p2  ;;  %p29_p4 = scmp.ge.s32.totalorder %s5665_s22, 2 }
   0x8   : > { %p4498_p5 = scmp.eq.s32.totalorder %s4016_s20, 0  ;;  %s179_s27 = sshll.u32 %s5651_s0, 4  ;;  %s180_s27 = int_to_ptr.vmem [resolvable:$true] %s179_s27 }
   0x9   : > { %p4228_p6 = pneg %p4494_p3  ;;  %s5667_s22 = smov (%p29_p4, %s5665_s22), 0 }
   0xa   : > { %s4354_s28 = scalar_lea.vmem %s180_s27, 16  ;;  %p4362_p12 = scmp.lt.s32.totalorder %s180_s27, %s180_s27 }
   0xb   : > { %p4229_p7 = pnand %p4498_p5, %p4228_p6  ;;  %p4355_p8 = scmp.ne.s32.totalorder %s180_s27, %s4354_s28 }
   0xc   : > { %p4363_p13 = scmp.lt.s32.totalorder %s4354_s28, %s4354_s28 }
   0xd   : > { %p4356_p9 = pneg %p4229_p7 }
   0xe   : > { %p4364_p0 = por %p4363_p13, %p4362_p12 }
   0xf   : > { %p4357_p10 = pnand %p4356_p9, %p4355_p8 }
  0x11   : > { %p4358_p11 = pneg %p4357_p10 }
  0x13   : > { %p4365_p1 = pnand %p4364_p0, %p4358_p11 }
  0x15   : > { %4368 = shalt.err (!%p4365_p1)
}
  0x16   : > { %s4413_s29 = smov [#allocation2]   ;;  %221 = sbr.rel (%p4494_p3) target bundleno = 1633 (0x661), region = 36 }
  0x17   : > { %4231 = dma.vmem_to_smem (!%p4229_p7), %s180_s27, 16, %s4413_s29, [#allocation3]  }
  0x1d   : > { %4390 = dma.done.wait (%p4498_p5), [#allocation3], 16  }
  0x1e   : > { %4392 = vsyncadd (%p4498_p5), [#allocation3], 4294967280 }
  0x1f   : > { %227 = sfence }
  0x20   : > { %s4029_s30 = sshll.u32 %s4399_s16, 2  ;;  %s4414_s10 = smov 120   ;;  %v4415_v4 = vmov 1983009808   ;;  %v392_v6 = vlaneseq  ;;  %v4416_v15 = vmov 1934713408  }
  0x21   : > { %s261_s5 = sadd.s32 %s4395_s15, %s4029_s30  ;;  %v390_v5 = vunpack.c.l.s4 %v4415_v4  ;;  %v454_v16 = vunpack.c.l.s4 %v4416_v15  ;;  %s4417_s11 = smov 8   ;;  %vm1043_vm0 = vcmask 64512   ;;  %vm1048_vm1 = vcmask 130048  }
  0x22   : > { %p262_p2 = scmp.lt.s32.totalorder %s261_s5, 7  ;;  %v4537_v10 = vshrl.u32 %v392_v6, 7  ;;  %s4418_s12 = smov 40   ;;  %vm1053_vm2 = vcmask 195584   ;;  %vm1058_vm3 = vcmask 261120   ;;  %vm1063_vm4 = vcmask 326656  }
  0x23   : > { %v391_v9 = vunpack.c.0.s8 %v390_v5  ;;  %v455_v34 = vunpack.c.0.s8 %v454_v16  ;;  %s4419_s13 = smov 16   ;;  %s4420_s14 = smov 24   ;;  %vm1068_vm5 = vcmask 392192   ;;  %vm1073_vm6 = vcmask 457728  }
  0x24   : > { %s5669_s5 = smov (!%p262_p2, %s261_s5), 7  ;;  %s4421_s20 = smov 48   ;;  %vm1834_vm7 = vcmask 523264   ;;  %vm4425_vm8 = vmmov 0   ;;  %vm2077_vm9 = vcmask 31744   ;;  %vm2574_vm10 = vcmask 519168  }
  0x25   : > { %s4065_s6 = sshll.u32 %s5669_s5, 7  ;;  %v4550_v17 = vsub.s32 %v391_v9, %v4537_v10  ;;  %v4593_v48 = vsub.s32 %v455_v34, %v4537_v10  ;;  %s4422_s23 = smov 32  }
  0x26   : > { %s4524_s9 = scalar_lea.vmem %s5653_s2, %s4065_s6  ;;  %s4423_s24 = smov 56  }
  0x27   : > { %v295_v0 = vld [vmem:[%s4524_s9 + $0x20] sm:$0xff]  ;;  %v297_v2 = vld [vmem:[%s4524_s9 + $0x30] sm:$0xff]  ;;  %v4544_v13 = vld [vmem:[%s4524_s9 + $0x18] sm:$0xff]  ;;  %s270_s29 = sadd.s32 2, %s4029_s30  ;;  %s4435_s26 = smov 72  }
  0x28   : > { %v291_v1 = vld [vmem:[%s4524_s9] sm:$0xff]  ;;  %335 = vrot.lane.b32.xlu1 %v295_v0, %s4414_s10  ;;  %v293_v3 = vld [vmem:[%s4524_s9 + $0x10] sm:$0xff]  ;;  %v4547_v14 = vld [vmem:[%s4524_s9 + $0x8] sm:$0xff]  ;;  %s4760_s30 = sadd.s32 %s4395_s15, %s270_s29 }
  0x29   : > { %331 = vrot.lane.b32.xlu0 %v291_v1, %s4414_s10  ;;  %v301_v7 = vld [vmem:[%s4524_s9 + $0x50] sm:$0xff]  ;;  %v299_v8 = vld [vmem:[%s4524_s9 + $0x40] sm:$0xff]  ;;  %v387_v18 = vcombine.low %v291_v1, %v295_v0  ;;  %v403_v19 = vcombine.low %v293_v3, %v297_v2  ;;  %v4553_v20 = vld [vmem:[%s4524_s9 + $0x38] sm:$0xff]  ;;  %v388_v32 = vcombine.high %v291_v1, %v295_v0  ;;  %v404_v33 = vcombine.high %v293_v3, %v297_v2  ;;  %p272_p3 = scmp.lt.s32.totalorder %s4760_s30, 7 }
  0x2a   : > { %v305_v11 = vld [vmem:[%s4524_s9 + $0x70] sm:$0xff]  ;;  %v303_v12 = vld [vmem:[%s4524_s9 + $0x60] sm:$0xff]  ;;  %v4556_v21 = vld [vmem:[%s4524_s9 + $0x28] sm:$0xff]  ;;  %v675_v25 = vcombine.low %v4544_v13, %v4553_v20  ;;  %v676_v62 = vcombine.high %v4544_v13, %v4553_v20 }
  0x2b   : > { %v4559_v22 = vld [vmem:[%s4524_s9 + $0x58] sm:$0xff]  ;;  %v435_v23 = vcombine.low %v301_v7, %v305_v11  ;;  %v419_v24 = vcombine.low %v299_v8, %v303_v12  ;;  %v659_v26 = vcombine.low %v4547_v14, %v4556_v21  ;;  %v4566_v27 = vld [vmem:[%s4524_s9 + $0x48] sm:$0xff]  ;;  %v395_v35 = vrot.slane %v387_v18, %v4550_v17  ;;  %s5671_s30 = smov (!%p272_p3, %s4760_s30), 7 }
  0x2c   : > { %337 = vrot.lane.b32.xlu1 %v297_v2, %s4414_s10  ;;  %v306_v28 = vld [vmem:[%s4524_s9 + $0x78] sm:$0xff]  ;;  %v4570_v29 = vld [vmem:[%s4524_s9 + $0x68] sm:$0xff]  ;;  %v411_v36 = vrot.slane %v403_v19, %v4550_v17  ;;  %v436_v37 = vcombine.high %v301_v7, %v305_v11  ;;  %v420_v38 = vcombine.high %v299_v8, %v303_v12  ;;  %v683_v41 = vrot.slane %v675_v25, %v4550_v17  ;;  %s4066_s7 = sshll.u32 %s5671_s30, 7  ;;  %s4434_s30 = smov 80  }
  0x2d   : > { %333 = vrot.lane.b32.xlu0 %v293_v3, %s4414_s10  ;;  %v707_v30 = vcombine.low %v4559_v22, %v306_v28  ;;  %v691_v31 = vcombine.low %v4566_v27, %v4570_v29  ;;  %v443_v39 = vrot.slane %v435_v23, %v4550_v17  ;;  %v427_v40 = vrot.slane %v419_v24, %v4550_v17  ;;  %s4822_s25 = scalar_lea.vmem %s5654_s3, %s4066_s7 }
  0x2e   : > { %v667_v42 = vrot.slane %v659_v26, %v4550_v17  ;;  %v402_v45 = vrot.slane %v388_v32, %v4550_v17  ;;  %v418_v46 = vrot.slane %v404_v33, %v4550_v17  ;;  %v450_v47 = vrot.slane %v436_v37, %v4550_v17 }
  0x2f   : > { %v715_v43 = vrot.slane %v707_v30, %v4550_v17  ;;  %v699_v44 = vrot.slane %v691_v31, %v4550_v17  ;;  %v434_v49 = vrot.slane %v420_v38, %v4550_v17  ;;  %v451_v51 = vcombine.low %v395_v35, %v411_v36 }
  0x30   : > { %341 = vrot.lane.b32.xlu1 %v301_v7, %s4414_s10  ;;  %v723_v50 = vcombine.low %v667_v42, %v683_v41  ;;  %v483_v52 = vcombine.low %v427_v40, %v443_v39  ;;  %v467_v54 = vcombine.low %v402_v45, %v418_v46  ;;  %v452_v60 = vcombine.high %v395_v35, %v411_v36 }
  0x31   : > { %339 = vrot.lane.b32.xlu0 %v299_v8, %s4414_s10  ;;  %v755_v53 = vcombine.low %v699_v44, %v715_v43  ;;  %v499_v56 = vcombine.low %v434_v49, %v450_v47  ;;  %v4604_v57 = vrot.slane %v451_v51, %v4593_v48  ;;  %v484_v61 = vcombine.high %v427_v40, %v443_v39 }
  0x32   : > { %v4601_v55 = vrot.slane %v723_v50, %v4593_v48  ;;  %v4607_v58 = vrot.slane %v483_v52, %v4593_v48  ;;  %v660_v63 = vcombine.high %v4547_v14, %v4556_v21  ;;  %v708_v0 = vcombine.high %v4559_v22, %v306_v28 }
  0x33   : > { %v4614_v59 = vrot.slane %v755_v53, %v4593_v48  ;;  %v692_v1 = vcombine.high %v4566_v27, %v4570_v29  ;;  %v724_v2 = vcombine.high %v667_v42, %v683_v41  ;;  %v475_v3 = vrot.slane %v467_v54, %v4593_v48 }
  0x34   : > { %345 = vrot.lane.b32.xlu1 %v305_v11, %s4414_s10  ;;  %v507_v4 = vrot.slane %v499_v56, %v4593_v48  ;;  %v516_v5 = vcombine.high %v4604_v57, %v4607_v58  ;;  %v756_v7 = vcombine.high %v699_v44, %v715_v43  ;;  %v466_v9 = vrot.slane %v452_v60, %v4593_v48 }
  0x35   : > { %343 = vrot.lane.b32.xlu0 %v303_v12, %s4414_s10  ;;  %v788_v8 = vcombine.high %v4601_v55, %v4614_v59  ;;  %v498_v11 = vrot.slane %v484_v61, %v4593_v48  ;;  %v690_v12 = vrot.slane %v676_v62, %v4550_v17  ;;  %v738_v15 = vrot.slane %v724_v2, %v4593_v48 }
  0x36   : > { %v770_v16 = vrot.slane %v756_v7, %v4593_v48  ;;  %v468_v18 = vcombine.high %v402_v45, %v418_v46  ;;  %v500_v19 = vcombine.high %v434_v49, %v450_v47  ;;  %v787_v43 = vcombine.low %v4601_v55, %v4614_v59 }
  0x37   : > { %v518_v26 = vcombine.high %v466_v9, %v498_v11  ;;  %v515_v44 = vcombine.low %v4604_v57, %v4607_v58  ;;  %v1830_v57 = vld [vmem:[%s5652_s1 + $0x20] sm:$0xff]  ;;  %v1831_v58 = vld [vmem:[%s5652_s1 + $0x28] sm:$0xff] }
  0x38   : > { %365 = vrot.lane.b32.xlu1 %v4544_v13, %s4414_s10  ;;  %v674_v13 = vrot.slane %v660_v63, %v4550_v17  ;;  %v789_v23 = vcombine.low %v738_v15, %v770_v16  ;;  %v482_v24 = vrot.slane %v468_v18, %v4593_v48  ;;  %v514_v25 = vrot.slane %v500_v19, %v4593_v48 }
  0x39   : > { %363 = vrot.lane.b32.xlu0 %v4547_v14, %s4414_s10  ;;  %v722_v14 = vrot.slane %v708_v0, %v4550_v17  ;;  %v790_v37 = vcombine.high %v738_v15, %v770_v16 }
  0x3a   : > { %v740_v30 = vcombine.high %v674_v13, %v690_v12  ;;  %v521_v32 = vcombine.low %v482_v24, %v514_v25  ;;  %v522_v40 = vcombine.high %v482_v24, %v514_v25 }
  0x3c   : > { %369 = vrot.lane.b32.xlu1 %v4553_v20, %s4414_s10  ;;  %v706_v20 = vrot.slane %v692_v1, %v4550_v17  ;;  %v4651_v35 = vrot.slane %v740_v30, %v4593_v48 }
  0x3d   : > { %367 = vrot.lane.b32.xlu0 %v4556_v21, %s4414_s10  ;;  %v520_v21 = vcombine.high %v475_v3, %v507_v4 }
  0x3e   : > { %v772_v31 = vcombine.high %v706_v20, %v722_v14 }
  0x40   : > { %373 = vrot.lane.b32.xlu1 %v4559_v22, %s4414_s10  ;;  %v517_v22 = vcombine.low %v466_v9, %v498_v11  ;;  %v4654_v36 = vrot.slane %v772_v31, %v4593_v48 }
  0x41   : > { %371 = vrot.lane.b32.xlu0 %v4566_v27, %s4414_s10  ;;  %v739_v27 = vcombine.low %v674_v13, %v690_v12 }
  0x42   : > { %v794_v39 = vcombine.high %v4651_v35, %v4654_v36  ;;  %v793_v41 = vcombine.low %v4651_v35, %v4654_v36  ;;  %v4869_v35 = vld [vmem:[%s4822_s25 + $0x48] sm:$0xff]  ;;  %v4872_v36 = vld [vmem:[%s4822_s25 + $0x78] sm:$0xff] }
  0x43   : > { %v747_v33 = vrot.slane %v739_v27, %v4593_v48 }
  0x44   : > { %377 = vrot.lane.b32.xlu1 %v306_v28, %s4414_s10  ;;  %v771_v28 = vcombine.low %v706_v20, %v722_v14 }
  0x45   : > { %375 = vrot.lane.b32.xlu0 %v4570_v29, %s4414_s10  ;;  %v519_v29 = vcombine.low %v475_v3, %v507_v4 }
  0x46   : > { %v779_v34 = vrot.slane %v771_v28, %v4593_v48 }
  0x48   : > { %939 = vrot.lane.b32.xlu1 %v788_v8, %s4417_s11  ;;  %v792_v38 = vcombine.high %v747_v33, %v779_v34  ;;  %v791_v42 = vcombine.low %v747_v33, %v779_v34 }
  0x49   : > { %935 = vrot.lane.b32.xlu0 %v516_v5, %s4417_s11 }
  0x4c   : > { %999 = vrot.lane.b32.xlu1 %v520_v21, %s4418_s12 }
  0x4d   : > { %951 = vrot.lane.b32.xlu0 %v517_v22, %s4419_s13 }
  0x50   : > { %955 = vrot.lane.b32.xlu1 %v789_v23, %s4419_s13 }
  0x51   : > { %967 = vrot.lane.b32.xlu0 %v518_v26, %s4420_s14 }
  0x54   : > { %1015 = vrot.lane.b32.xlu1 %v521_v32, %s4421_s20 }
  0x55   : > { %983 = vrot.lane.b32.xlu0 %v519_v29, %s4422_s23 }
  0x58   : > { %971 = vrot.lane.b32.xlu1 %v790_v37, %s4420_s14 }
  0x59   : > { %1003 = vrot.lane.b32.xlu0 %v792_v38, %s4418_s12 }
  0x5c   : > { %1031 = vrot.lane.b32.xlu1 %v522_v40, %s4423_s24 }
  0x5d   : > { %1019 = vrot.lane.b32.xlu0 %v793_v41, %s4421_s20 }
  0x60   : > { %987 = vrot.lane.b32.xlu1 %v791_v42, %s4422_s23 }
  0x9a   : > { %v336_v45 = vpop.permute.xlu1 %335 }
  0x9b   : > { %v332_v46 = vpop.permute.xlu0 %331 }
  0x9c   : > { %v523_v54 = vcombine.low %v332_v46, %v336_v45  ;;  %v524_v56 = vcombine.high %v332_v46, %v336_v45 }
  0x9e   : > { %v338_v47 = vpop.permute.xlu1 %337  ;;  %v531_v4 = vrot.slane %v523_v54, %v4550_v17  ;;  %v4677_v5 = vrot.slane %v524_v56, %v4550_v17 }
  0x9f   : > { %v334_v49 = vpop.permute.xlu0 %333 }
  0xa0   : > { %v539_v50 = vcombine.low %v334_v49, %v338_v47  ;;  %v540_v51 = vcombine.high %v334_v49, %v338_v47 }
  0xa2   : > { %v342_v52 = vpop.permute.xlu1 %341  ;;  %v547_v60 = vrot.slane %v539_v50, %v4550_v17  ;;  %v4673_v61 = vrot.slane %v540_v51, %v4550_v17 }
  0xa3   : > { %v340_v53 = vpop.permute.xlu0 %339 }
  0xa4   : > { %v587_v12 = vcombine.low %v531_v4, %v547_v60  ;;  %v603_v13 = vcombine.low %v4677_v5, %v4673_v61  ;;  %v588_v20 = vcombine.high %v531_v4, %v547_v60 }
  0xa6   : > { %v346_v62 = vpop.permute.xlu1 %345  ;;  %v4698_v25 = vrot.slane %v587_v12, %v4593_v48  ;;  %v4701_v26 = vrot.slane %v603_v13, %v4593_v48  ;;  %v602_v34 = vrot.slane %v588_v20, %v4593_v48 }
  0xa7   : > { %v344_v63 = vpop.permute.xlu0 %343  ;;  %v571_v0 = vcombine.low %v342_v52, %v346_v62  ;;  %v572_v1 = vcombine.high %v342_v52, %v346_v62 }
  0xa8   : > { %v555_v2 = vcombine.low %v340_v53, %v344_v63  ;;  %v556_v3 = vcombine.high %v340_v53, %v344_v63  ;;  %v1826_v63 = vld [vmem:[%s5652_s1] sm:$0xff] }
  0xa9   : > { %v579_v7 = vrot.slane %v571_v0, %v4550_v17  ;;  %v4681_v8 = vrot.slane %v572_v1, %v4550_v17  ;;  %v1827_v0 = vld [vmem:[%s5652_s1 + $0x8] sm:$0xff] }
  0xaa   : > { %v563_v9 = vrot.slane %v555_v2, %v4550_v17  ;;  %v4685_v11 = vrot.slane %v556_v3, %v4550_v17  ;;  %v366_v14 = vpop.permute.xlu1 %365  ;;  %v4192_v12 = vpack.c.bf16 %v1827_v0, %v1826_v63 }
  0xab   : > { %v364_v15 = vpop.permute.xlu0 %363 }
  0xac   : > { %v619_v16 = vcombine.low %v563_v9, %v579_v7  ;;  %v620_v18 = vcombine.high %v563_v9, %v579_v7  ;;  %v635_v19 = vcombine.low %v4685_v11, %v4681_v8  ;;  %4193 = vmatprep.subr.bf16.mxu0 %v4192_v12  ;;  %4209 = vmatprep.subr.bf16.mxu1 %v4192_v12 }
  0xad   : > { %4195 = vmatpush3.bf16.msra.mxu0 %v4192_v12  ;;  %4211 = vmatpush3.bf16.msra.mxu1 %v4192_v12  ;;  %v4828_v12 = vld [vmem:[%s4822_s25 + $0x10] sm:$0xff] }
  0xae   : > { %v4692_v21 = vrot.slane %v619_v16, %v4593_v48  ;;  %v4695_v22 = vrot.slane %v635_v19, %v4593_v48  ;;  %v370_v23 = vpop.permute.xlu1 %369  ;;  %v634_v29 = vrot.slane %v620_v18, %v4593_v48  ;;  %v1829_v16 = vld [vmem:[%s5652_s1 + $0x18] sm:$0xff] }
  0xaf   : > { %v368_v24 = vpop.permute.xlu0 %367  ;;  %v811_v27 = vcombine.low %v366_v14, %v370_v23  ;;  %v812_v28 = vcombine.high %v366_v14, %v370_v23 }
  0xb0   : > { %v795_v30 = vcombine.low %v364_v15, %v368_v24  ;;  %v796_v31 = vcombine.high %v364_v15, %v368_v24  ;;  %v652_v32 = vcombine.high %v4698_v25, %v4692_v21  ;;  %v655_v33 = vcombine.low %v4701_v26, %v4695_v22  ;;  %v1828_v15 = vld [vmem:[%s5652_s1 + $0x10] sm:$0xff] }
  0xb1   : > { %v4712_v40 = vrot.slane %v811_v27, %v4550_v17  ;;  %v653_v41 = vcombine.low %v602_v34, %v634_v29  ;;  %v4715_v42 = vrot.slane %v812_v28, %v4550_v17  ;;  %v651_v47 = vcombine.low %v4698_v25, %v4692_v21 }
  0xb2   : > { %937 = vrot.lane.b32.xlu1 %v652_v32, %s4417_s11  ;;  %985 = vrot.lane.b32.xlu0 %v655_v33, %s4422_s23  ;;  %v374_v37 = vpop.permute.xlu1 %373  ;;  %v4718_v45 = vrot.slane %v795_v30, %v4550_v17  ;;  %v4721_v46 = vrot.slane %v796_v31, %v4550_v17  ;;  %v654_v62 = vcombine.high %v602_v34, %v634_v29 }
  0xb3   : > { %v372_v38 = vpop.permute.xlu0 %371  ;;  %v4196_v29 = vpack.c.bf16 %v1829_v16, %v1828_v15 }
  0xb4   : > { %v859_v56 = vcombine.low %v4718_v45, %v4712_v40  ;;  %v875_v60 = vcombine.low %v4721_v46, %v4715_v42  ;;  %v860_v34 = vcombine.high %v4718_v45, %v4712_v40  ;;  %v4200_v40 = vpack.c.bf16 %v1831_v58, %v1830_v57 }
  0xb5   : > { %4197 = vmatprep.subr.bf16.mxu0 %v4196_v29  ;;  %4213 = vmatprep.subr.bf16.mxu1 %v4196_v29 }
  0xb6   : > { %953 = vrot.lane.b32.xlu1 %v653_v41, %s4419_s13  ;;  %v378_v49 = vpop.permute.xlu1 %377  ;;  %v883_v18 = vrot.slane %v875_v60, %v4593_v48  ;;  %v4754_v20 = vrot.slane %v859_v56, %v4593_v48  ;;  %v636_v41 = vcombine.high %v4685_v11, %v4681_v8  ;;  %4199 = vmatpush3.bf16.msra.mxu0 %v4196_v29  ;;  %v1832_v56 = vld [vmem:[%s5652_s1 + $0x30] sm:$0xff] }
  0xb7   : > { %v376_v50 = vpop.permute.xlu0 %375  ;;  %v843_v51 = vcombine.low %v374_v37, %v378_v49  ;;  %v844_v52 = vcombine.high %v374_v37, %v378_v49  ;;  %v876_v37 = vcombine.high %v4721_v46, %v4715_v42  ;;  %v656_v42 = vcombine.high %v4701_v26, %v4695_v22  ;;  %4201 = vmatprep.subr.bf16.mxu0 %v4200_v40 }
  0xb8   : > { %v827_v53 = vcombine.low %v372_v38, %v376_v50  ;;  %v828_v54 = vcombine.high %v372_v38, %v376_v50  ;;  %4215 = vmatpush3.bf16.msra.mxu1 %v4196_v29  ;;  %v604_v11 = vcombine.high %v4677_v5, %v4673_v61  ;;  %v874_v26 = vrot.slane %v860_v34, %v4593_v48  ;;  %v1833_v61 = vld [vmem:[%s5652_s1 + $0x38] sm:$0xff] }
  0xb9   : > { %v851_v1 = vrot.slane %v843_v51, %v4550_v17  ;;  %v858_v2 = vrot.slane %v844_v52, %v4550_v17  ;;  %4217 = vmatprep.subr.bf16.mxu1 %v4200_v40  ;;  %v890_v22 = vrot.slane %v876_v37, %v4593_v48  ;;  %v650_v52 = vrot.slane %v636_v41, %v4593_v48  ;;  %v4852_v29 = vld [vmem:[%s4822_s25 + $0x18] sm:$0xff] }
  0xba   : > { %v835_v3 = vrot.slane %v827_v53, %v4550_v17  ;;  %v842_v4 = vrot.slane %v828_v54, %v4550_v17  ;;  %969 = vrot.lane.b32.xlu1 %v654_v62, %s4420_s14  ;;  %v4743_v7 = vpop.permute.xlu1 %939  ;;  %4203 = vmatpush3.bf16.msra.mxu0 %v4200_v40  ;;  %v4204_v63 = vpack.c.bf16 %v1833_v61, %v1832_v56 }
  0xbb   : > { %v936_v9 = vpop.permute.xlu0 %935  ;;  %v618_v0 = vrot.slane %v604_v11, %v4593_v48 }
  0xbc   : > { %v891_v13 = vcombine.low %v835_v3, %v851_v1  ;;  %v907_v14 = vcombine.low %v842_v4, %v858_v2  ;;  %v1044_v27 = vsel %vm1043_vm0, %v515_v44, %v936_v9  ;;  %v892_v30 = vcombine.high %v835_v3, %v851_v1  ;;  %4219 = vmatpush3.bf16.msra.mxu1 %v4200_v40 }
  0xbd   : > { %v908_v31 = vcombine.high %v842_v4, %v858_v2  ;;  %4205 = vmatprep.subr.bf16.mxu0 %v4204_v63  ;;  %4221 = vmatprep.subr.bf16.mxu1 %v4204_v63  ;;  %v657_v4 = vcombine.low %v618_v0, %v650_v52 }
  0xbe   : > { %v915_v19 = vrot.slane %v907_v14, %v4593_v48  ;;  %v4757_v23 = vrot.slane %v891_v13, %v4593_v48  ;;  %v1000_v24 = vpop.permute.xlu1 %999  ;;  %v906_v51 = vrot.slane %v892_v30, %v4593_v48  ;;  %4207 = vmatpush3.bf16.msra.mxu0 %v4204_v63  ;;  %v4424_v14 = vmov 0.0   ;;  %v4855_v30 = vld [vmem:[%s4822_s25 + $0x8] sm:$0xff] }
  0xbf   : > { %v952_v28 = vpop.permute.xlu0 %951  ;;  %v922_v50 = vrot.slane %v908_v31, %v4593_v48  ;;  %4152 = vmatprep.subr.mxu0 %v4424_v14  ;;  %v4858_v31 = vld [vmem:[%s4822_s25 + $0x38] sm:$0xff] }
  0xc0   : > { %v927_v32 = vcombine.low %v883_v18, %v915_v19  ;;  %v924_v33 = vcombine.high %v4754_v20, %v4757_v23  ;;  %v1049_v44 = vsel %vm1048_vm1, %v1044_v27, %v952_v28  ;;  %v923_v38 = vcombine.low %v4754_v20, %v4757_v23  ;;  %4223 = vmatpush3.bf16.msra.mxu1 %v4204_v63  ;;  %v307_v27 = vld [vmem:[%s4822_s25] sm:$0xff]  ;;  %v321_v28 = vld [vmem:[%s4822_s25 + $0x70] sm:$0xff] }
  0xc1   : > { %v928_v49 = vcombine.high %v883_v18, %v915_v19  ;;  %v929_v5 = vcombine.low %v890_v22, %v922_v50  ;;  %v925_v60 = vcombine.low %v874_v26, %v906_v51  ;;  %v930_v3 = vcombine.high %v890_v22, %v922_v50  ;;  %4157 = vmatprep.subr.mxu1 %v4424_v14  ;;  %v313_v18 = vld [vmem:[%s4822_s25 + $0x30] sm:$0xff] }
  0xc2   : > { %989 = vrot.lane.b32.xlu1 %v927_v32, %s4422_s23  ;;  %941 = vrot.lane.b32.xlu0 %v924_v33, %s4417_s11  ;;  %v4788_v45 = vpop.permute.xlu1 %955  ;;  %v926_v15 = vcombine.high %v874_v26, %v906_v51  ;;  %v658_v19 = vcombine.high %v618_v0, %v650_v52  ;;  %v4861_v32 = vld [vmem:[%s4822_s25 + $0x28] sm:$0xff]  ;;  %v4864_v33 = vld [vmem:[%s4822_s25 + $0x58] sm:$0xff]  ;;  %v1430_v34 = vcombine.low %v4852_v29, %v4858_v31 }
  0xc3   : > { %v968_v46 = vpop.permute.xlu0 %967  ;;  %v1414_v37 = vcombine.low %v4855_v30, %v4861_v32  ;;  %v1462_v57 = vcombine.low %v4864_v33, %v4872_v36  ;;  %v1159_v50 = vcombine.high %v4828_v12, %v313_v18  ;;  %v319_v51 = vld [vmem:[%s4822_s25 + $0x60] sm:$0xff] }
  0xc4   : > { %v1054_v8 = vsel %vm1053_vm2, %v1049_v44, %v968_v46  ;;  %v311_v44 = vld [vmem:[%s4822_s25 + $0x20] sm:$0xff]  ;;  %v1438_v40 = vrot.slane %v1430_v34, %v4550_v17 }
  0xc5   : > { %v1422_v41 = vrot.slane %v1414_v37, %v4550_v17  ;;  %v1142_v56 = vcombine.low %v307_v27, %v311_v44 }
  0xc6   : > { %1005 = vrot.lane.b32.xlu1 %v928_v49, %s4418_s12  ;;  %1001 = vrot.lane.b32.xlu0 %v656_v42, %s4418_s12  ;;  %v1016_v53 = vpop.permute.xlu1 %1015  ;;  %v1470_v42 = vrot.slane %v1462_v57, %v4550_v17  ;;  %v315_v49 = vld [vmem:[%s4822_s25 + $0x40] sm:$0xff] }
  0xc7   : > { %v984_v54 = vpop.permute.xlu0 %983  ;;  %v1175_v22 = vcombine.high %v315_v49, %v319_v51  ;;  %v1478_v26 = vcombine.low %v1422_v41, %v1438_v40  ;;  %v1174_v63 = vcombine.low %v315_v49, %v319_v51  ;;  %v1479_v37 = vcombine.high %v1422_v41, %v1438_v40 }
  0xc8   : > { %v1059_v62 = vsel %vm1058_vm3, %v1054_v8, %v984_v54  ;;  %v1143_v8 = vcombine.high %v307_v27, %v311_v44  ;;  %v1173_v54 = vrot.slane %v1159_v50, %v4550_v17 }
  0xc9   : > { %v1064_v1 = vsel %vm1063_vm4, %v1059_v62, %v1000_v24  ;;  %v317_v24 = vld [vmem:[%s4822_s25 + $0x50] sm:$0xff]  ;;  %v1189_v62 = vrot.slane %v1175_v22, %v4550_v17  ;;  %v4908_v0 = vrot.slane %v1478_v26, %v4593_v48 }
  0xca   : > { %1021 = vrot.lane.b32.xlu1 %v929_v5, %s4421_s20  ;;  %957 = vrot.lane.b32.xlu0 %v925_v60, %s4419_s13  ;;  %v4817_v2 = vpop.permute.xlu1 %971  ;;  %v1069_v9 = vsel %vm1068_vm5, %v1064_v1, %v1016_v53  ;;  %v1191_v11 = vcombine.high %v317_v24, %v321_v28  ;;  %v1158_v53 = vcombine.low %v4828_v12, %v313_v18 }
  0xcb   : > { %v1157_v61 = vrot.slane %v1143_v8, %v4550_v17  ;;  %v1190_v5 = vcombine.low %v317_v24, %v321_v28 }
  0xcc   : > { %v1205_v60 = vrot.slane %v1191_v11, %v4550_v17 }
  0xcd   : > { %v1223_v41 = vcombine.high %v1157_v61, %v1173_v54 }
  0xce   : > { %1037 = vrot.lane.b32.xlu1 %v930_v3, %s4423_s24  ;;  %1017 = vrot.lane.b32.xlu0 %v657_v4, %s4421_s20  ;;  %v1032_v13 = vpop.permute.xlu1 %1031  ;;  %v1166_v3 = vrot.slane %v1158_v53, %v4550_v17  ;;  %v1150_v4 = vrot.slane %v1142_v56, %v4550_v17 }
  0xcf   : > { %v4833_v16 = vsel %vm1073_vm6, %v1069_v9, %v1032_v13  ;;  %v1222_v9 = vcombine.low %v1157_v61, %v1173_v54  ;;  %v1198_v13 = vrot.slane %v1190_v5, %v4550_v17 }
  0xd0   : > { %4124 = vmatprep.mubr.msk.f32.mxu0 %vm1834_vm7, %v4833_v16 }
  0xd2   : > { %973 = vrot.lane.b32.xlu0 %v926_v15, %s4420_s14  ;;  %1088 = vrot.lane.b32.xlu1 %v4828_v12, %s4414_s10  ;;  %v1254_v12 = vcombine.low %v1189_v62, %v1205_v60  ;;  %v1182_v15 = vrot.slane %v1174_v63, %v4550_v17 }
  0xd4   : > { %v1238_v34 = vcombine.low %v1182_v15, %v1198_v13  ;;  %v1239_v8 = vcombine.high %v1182_v15, %v1198_v13  ;;  %v1004_v13 = vpop.permute.xlu0 %1003 }
  0xd6   : > { %1033 = vrot.lane.b32.xlu0 %v658_v19, %s4423_s24  ;;  %1092 = vrot.lane.b32.xlu1 %v313_v18, %s4414_s10  ;;  %v4924_v19 = vrot.slane %v1222_v9, %v4593_v48  ;;  %v4946_v50 = vrot.slane %v1238_v34, %v4593_v48  ;;  %v988_v9 = vpop.permute.xlu1 %987 }
  0xd8   : > { %v1020_v34 = vpop.permute.xlu0 %1019 }
  0xda   : > { %1035 = vrot.lane.b32.xlu0 %v794_v39, %s4423_s24  ;;  %1096 = vrot.lane.b32.xlu1 %v317_v24, %s4414_s10  ;;  %v4875_v39 = vld [vmem:[%s4822_s25 + $0x68] sm:$0xff]  ;;  %v4927_v24 = vrot.slane %v1254_v12, %v4593_v48 }
  0xdb   : > { %v1446_v58 = vcombine.low %v4869_v35, %v4875_v39 }
  0xdd   : > { %v1454_v46 = vrot.slane %v1446_v58, %v4550_v17  ;;  %v4935_v58 = vrot.slane %v1479_v37, %v4593_v48 }
  0xde   : > { %1086 = vrot.lane.b32.xlu0 %v307_v27, %s4414_s10  ;;  %1100 = vrot.lane.b32.xlu1 %v321_v28, %s4414_s10  ;;  %v1275_v27 = vcombine.high %v4924_v19, %v4927_v24  ;;  %v1206_v28 = vcombine.low %v1150_v4, %v1166_v3 }
  0xdf   : > { %v1510_v52 = vcombine.low %v1454_v46, %v1470_v42  ;;  %v1511_v57 = vcombine.high %v1454_v46, %v1470_v42  ;;  %v1255_v42 = vcombine.high %v1189_v62, %v1205_v60  ;;  %v4951_v46 = vrot.slane %v1223_v41, %v4593_v48 }
  0xe0   : > { %v1274_v60 = vcombine.low %v4924_v19, %v4927_v24 }
  0xe1   : > { %v4911_v1 = vrot.slane %v1510_v52, %v4593_v48  ;;  %v4954_v11 = vrot.slane %v1255_v42, %v4593_v48  ;;  %v1253_v52 = vrot.slane %v1239_v8, %v4593_v48 }
  0xe2   : > { %1090 = vrot.lane.b32.xlu0 %v311_v44, %s4414_s10  ;;  %1120 = vrot.lane.b32.xlu1 %v4852_v29, %s4414_s10  ;;  %v4938_v44 = vrot.slane %v1511_v57, %v4593_v48 }
  0xe3   : > { %v1543_v18 = vcombine.high %v4908_v0, %v4911_v1  ;;  %v1276_v53 = vcombine.low %v4951_v46, %v4954_v11  ;;  %v1277_v61 = vcombine.high %v4951_v46, %v4954_v11  ;;  %v1542_v63 = vcombine.low %v4908_v0, %v4911_v1 }
  0xe4   : > { %v1544_v40 = vcombine.low %v4935_v58, %v4938_v44  ;;  %v1545_v54 = vcombine.high %v4935_v58, %v4938_v44 }
  0xe6   : > { %1094 = vrot.lane.b32.xlu0 %v315_v49, %s4414_s10  ;;  %1124 = vrot.lane.b32.xlu1 %v4858_v31, %s4414_s10  ;;  %v4943_v49 = vrot.slane %v1206_v28, %v4593_v48 }
  0xe8   : > { %v1271_v22 = vcombine.high %v4943_v49, %v4946_v50  ;;  %v1270_v62 = vcombine.low %v4943_v49, %v4946_v50 }
  0xea   : > { %1098 = vrot.lane.b32.xlu0 %v319_v51, %s4414_s10  ;;  %1128 = vrot.lane.b32.xlu1 %v4864_v33, %s4414_s10  ;;  %v1207_v51 = vcombine.high %v1150_v4, %v1166_v3  ;;  %v2029_v3 = vmul.f32 %v4833_v16, %v4833_v16 }
  0xec   : > { %v1221_v26 = vrot.slane %v1207_v51, %v4593_v48  ;;  %v2033_v4 = vsel %vm1834_vm7, %v2029_v3, 0.0 }
  0xed   : > { %v2034_v12 = vrot.slane %v2033_v4, 4 }
  0xee   : > { %1118 = vrot.lane.b32.xlu0 %v4855_v30, %s4414_s10  ;;  %1132 = vrot.lane.b32.xlu1 %v4872_v36, %s4414_s10  ;;  %v1272_v56 = vcombine.low %v1221_v26, %v1253_v52  ;;  %v1273_v5 = vcombine.high %v1221_v26, %v1253_v52 }
  0xef   : > { %v2035_v15 = vadd.f32 %v2034_v12, %v2033_v4  ;;  %v1046_v4 = vsel %vm1043_vm0, %v787_v43, %v4743_v7 }
  0xf0   : > { %v1051_v12 = vsel %vm1048_vm1, %v1046_v4, %v4788_v45 }
  0xf1   : > { %v2036_v28 = vrot.slane %v2035_v15, 2 }
  0xf2   : > { %1122 = vrot.lane.b32.xlu0 %v4861_v32, %s4414_s10  ;;  %1694 = vrot.lane.b32.xlu1 %v1543_v18, %s4417_s11 }
  0xf3   : > { %v2037_v57 = vadd.f32 %v2036_v28, %v2035_v15 }
  0xf5   : > { %v2038_v51 = vrot.slane %v2037_v57, 1 }
  0xf6   : > { %1126 = vrot.lane.b32.xlu0 %v4869_v35, %s4414_s10 }
  0xf7   : > { %v2039_v42 = vadd.f32 %v2038_v51, %v2037_v57 }
  0xf9   : > { %v2061_v52 = vmax.f32 %v2039_v42, 1e-24  ;;  %v1056_v42 = vsel %vm1053_vm2, %v1051_v12, %v4817_v2 }
  0xfa   : > { %1130 = vrot.lane.b32.xlu0 %v4875_v39, %s4414_s10 }
  0xfb   : > { %4314 = vrsqrt.f32 %v2061_v52 }
  0xfe   : > { %1690 = vrot.lane.b32.xlu0 %v1271_v22, %s4417_s11 }
 0x102   : > { %1706 = vrot.lane.b32.xlu0 %v1272_v56, %s4419_s13 }
 0x105   : > { %v4315_v25 = vpop.eup %4314 }
 0x106   : > { %1722 = vrot.lane.b32.xlu0 %v1273_v5, %s4420_s14 }
 0x10a   : > { %1738 = vrot.lane.b32.xlu0 %v1274_v60, %s4422_s23 }
 0x124   : > { %v938_v18 = vpop.permute.xlu1 %937  ;;  %v986_v8 = vpop.permute.xlu0 %985 }
 0x125   : > { %v1045_v57 = vsel %vm1043_vm0, %v651_v47, %v938_v18  ;;  %v1061_v47 = vsel %vm1058_vm3, %v1056_v42, %v988_v9 }
 0x128   : > { %v954_v37 = vpop.permute.xlu1 %953 }
 0x129   : > { %v1050_v51 = vsel %vm1048_vm1, %v1045_v57, %v954_v37 }
 0x12c   : > { %v970_v41 = vpop.permute.xlu1 %969 }
 0x12d   : > { %v1055_v52 = vsel %vm1053_vm2, %v1050_v51, %v970_v41  ;;  %v1066_v41 = vsel %vm1063_vm4, %v1061_v47, %v1004_v13 }
 0x12e   : > { %v1060_v45 = vsel %vm1058_vm3, %v1055_v52, %v986_v8  ;;  %v1071_v8 = vsel %vm1068_vm5, %v1066_v41, %v1020_v34 }
 0x134   : > { %v990_v22 = vpop.permute.xlu1 %989  ;;  %v942_v26 = vpop.permute.xlu0 %941 }
 0x135   : > { %v1047_v55 = vsel %vm1043_vm0, %v923_v38, %v942_v26  ;;  %v2069_v26 = vmul.f32 %v4315_v25, %v4833_v16 }
 0x138   : > { %v1006_v56 = vpop.permute.xlu1 %1005  ;;  %v1002_v5 = vpop.permute.xlu0 %1001 }
 0x139   : > { %v1065_v18 = vsel %vm1063_vm4, %v1060_v45, %v1002_v5 }
 0x13c   : > { %v1022_v60 = vpop.permute.xlu1 %1021  ;;  %v958_v3 = vpop.permute.xlu0 %957 }
 0x13d   : > { %v1052_v59 = vsel %vm1048_vm1, %v1047_v55, %v958_v3 }
 0x140   : > { %v1038_v15 = vpop.permute.xlu1 %1037  ;;  %v1018_v28 = vpop.permute.xlu0 %1017 }
 0x141   : > { %v1070_v37 = vsel %vm1068_vm5, %v1065_v18, %v1018_v28 }
 0x144   : > { %v974_v43 = vpop.permute.xlu0 %973  ;;  %v1089_v7 = vpop.permute.xlu1 %1088 }
 0x145   : > { %v1057_v21 = vsel %vm1053_vm2, %v1052_v59, %v974_v43 }
 0x146   : > { %v1062_v2 = vsel %vm1058_vm3, %v1057_v21, %v990_v22 }
 0x147   : > { %v1067_v20 = vsel %vm1063_vm4, %v1062_v2, %v1006_v56 }
 0x148   : > { %v1034_v23 = vpop.permute.xlu0 %1033  ;;  %v1093_v38 = vpop.permute.xlu1 %1092  ;;  %v1072_v9 = vsel %vm1068_vm5, %v1067_v20, %v1022_v60 }
 0x149   : > { %v5011_v3 = vsel %vm1073_vm6, %v1070_v37, %v1034_v23  ;;  %v5024_v16 = vsel %vm1073_vm6, %v1072_v9, %v1038_v15  ;;  %v1294_v12 = vcombine.low %v1089_v7, %v1093_v38  ;;  %v1295_v57 = vcombine.high %v1089_v7, %v1093_v38 }
 0x14a   : > { %4125 = vmatmul.mubr.msk.f32.vlgmr.msra.gmra.mrb[0].mxu0 %vm1834_vm7, %v5011_v3 }
 0x14b   : > { %4153 = vmatpush3.msra.mxu0 %v2069_v26  ;;  %v1302_v55 = vrot.slane %v1294_v12, %v4550_v17  ;;  %v5033_v43 = vrot.slane %v1295_v57, %v4550_v17 }
 0x14c   : > { %v1036_v22 = vpop.permute.xlu0 %1035  ;;  %v1097_v5 = vpop.permute.xlu1 %1096  ;;  %4162 = vmatprep.subr.mxu0 %v4424_v14 }
 0x14d   : > { %v5019_v56 = vsel %vm1073_vm6, %v1071_v8, %v1036_v22 }
 0x14e   : > { %4127 = vmatprep.mubr.msk.f32.mxu0 %vm1834_vm7, %v5019_v56 }
 0x14f   : > { %4128 = vmatmul.mubr.msk.f32.gmra.mrb[2].mxu0 %vm1834_vm7, %v5024_v16 }
 0x150   : > { %v1087_v13 = vpop.permute.xlu0 %1086  ;;  %v1101_v60 = vpop.permute.xlu1 %1100  ;;  %4154 = vmatprep.mubr.msk.f32.mxu0 %vm4425_vm8, %v4424_v14 }
 0x151   : > { %v1326_v52 = vcombine.low %v1097_v5, %v1101_v60  ;;  %v1327_v15 = vcombine.high %v1097_v5, %v1101_v60 }
 0x153   : > { %v1334_v47 = vrot.slane %v1326_v52, %v4550_v17  ;;  %v5042_v2 = vrot.slane %v1327_v15, %v4550_v17 }
 0x154   : > { %v1091_v4 = vpop.permute.xlu0 %1090  ;;  %v5028_v34 = vpop.permute.xlu1 %1120 }
 0x155   : > { %v1278_v28 = vcombine.low %v1087_v13, %v1091_v4  ;;  %v1279_v51 = vcombine.high %v1087_v13, %v1091_v4 }
 0x157   : > { %v1286_v59 = vrot.slane %v1278_v28, %v4550_v17  ;;  %v5036_v21 = vrot.slane %v1279_v51, %v4550_v17 }
 0x158   : > { %v1095_v42 = vpop.permute.xlu0 %1094  ;;  %v5038_v25 = vpop.permute.xlu1 %1124 }
 0x159   : > { %v1342_v7 = vcombine.low %v1286_v59, %v1302_v55  ;;  %v1358_v20 = vcombine.low %v5036_v21, %v5033_v43  ;;  %v1343_v23 = vcombine.high %v1286_v59, %v1302_v55 }
 0x15b   : > { %v5057_v13 = vrot.slane %v1342_v7, %v4593_v48  ;;  %v5060_v60 = vrot.slane %v1358_v20, %v4593_v48  ;;  %v1357_v12 = vrot.slane %v1343_v23, %v4593_v48 }
 0x15c   : > { %v1099_v45 = vpop.permute.xlu0 %1098  ;;  %v5052_v9 = vpop.permute.xlu1 %1128 }
 0x15d   : > { %v1310_v18 = vcombine.low %v1095_v42, %v1099_v45  ;;  %v1311_v37 = vcombine.high %v1095_v42, %v1099_v45  ;;  %v1566_v42 = vcombine.low %v5028_v34, %v5038_v25 }
 0x15f   : > { %v1318_v38 = vrot.slane %v1310_v18, %v4550_v17  ;;  %v5048_v41 = vrot.slane %v1311_v37, %v4550_v17  ;;  %v1574_v18 = vrot.slane %v1566_v42, %v4550_v17  ;;  %v1415_v42 = vcombine.high %v4855_v30, %v4861_v32 }
 0x160   : > { %v5050_v26 = vpop.permute.xlu0 %1118  ;;  %v1133_v59 = vpop.permute.xlu1 %1132 }
 0x161   : > { %v1374_v8 = vcombine.low %v1318_v38, %v1334_v47  ;;  %v1375_v22 = vcombine.high %v1318_v38, %v1334_v47  ;;  %v1390_v5 = vcombine.low %v5048_v41, %v5042_v2  ;;  %v1598_v20 = vcombine.low %v5052_v9, %v1133_v59 }
 0x163   : > { %v5063_v4 = vrot.slane %v1374_v8, %v4593_v48  ;;  %v1389_v28 = vrot.slane %v1375_v22, %v4593_v48  ;;  %v1398_v57 = vrot.slane %v1390_v5, %v4593_v48  ;;  %v1606_v22 = vrot.slane %v1598_v20, %v4550_v17 }
 0x164   : > { %v1123_v51 = vpop.permute.xlu0 %1122 }
 0x165   : > { %v1550_v52 = vcombine.low %v5050_v26, %v1123_v51  ;;  %v1407_v55 = vcombine.high %v5057_v13, %v5063_v4  ;;  %v1410_v15 = vcombine.low %v5060_v60, %v1398_v57  ;;  %v1408_v47 = vcombine.low %v1357_v12, %v1389_v28 }
 0x166   : > { %v1406_v7 = vcombine.low %v5057_v13, %v5063_v4  ;;  %v1409_v23 = vcombine.high %v1357_v12, %v1389_v28  ;;  %v1447_v12 = vcombine.high %v4869_v35, %v4875_v39  ;;  %v1359_v35 = vcombine.high %v5036_v21, %v5033_v43 }
 0x167   : > { %1692 = vrot.lane.b32.xlu1 %v1407_v55, %s4417_s11  ;;  %1740 = vrot.lane.b32.xlu0 %v1410_v15, %s4422_s23  ;;  %v1558_v37 = vrot.slane %v1550_v52, %v4550_v17  ;;  %v1431_v15 = vcombine.high %v4852_v29, %v4858_v31  ;;  %v1463_v52 = vcombine.high %v4864_v33, %v4872_v36 }
 0x168   : > { %v1127_v45 = vpop.permute.xlu0 %1126  ;;  %v1429_v31 = vrot.slane %v1415_v42, %v4550_v17  ;;  %v1461_v33 = vrot.slane %v1447_v12, %v4550_v17  ;;  %v1391_v36 = vcombine.high %v5048_v41, %v5042_v2  ;;  %v1567_v39 = vcombine.high %v5028_v34, %v5038_v25 }
 0x169   : > { %v1614_v8 = vcombine.low %v1558_v37, %v1574_v18  ;;  %v1615_v20 = vcombine.high %v1558_v37, %v1574_v18  ;;  %v1445_v30 = vrot.slane %v1431_v15, %v4550_v17  ;;  %v1477_v32 = vrot.slane %v1463_v52, %v4550_v17 }
 0x16a   : > { %v1551_v24 = vcombine.high %v5050_v26, %v1123_v51  ;;  %v1411_v18 = vcombine.high %v5060_v60, %v1398_v57  ;;  %v1581_v2 = vrot.slane %v1567_v39, %v4550_v17  ;;  %v1373_v26 = vrot.slane %v1359_v35, %v4593_v48 }
 0x16b   : > { %1708 = vrot.lane.b32.xlu1 %v1408_v47, %s4419_s13  ;;  %v5094_v47 = vrot.slane %v1614_v8, %v4593_v48  ;;  %v1629_v37 = vrot.slane %v1615_v20, %v4593_v48  ;;  %v1494_v21 = vcombine.low %v1429_v31, %v1445_v30  ;;  %v1526_v25 = vcombine.low %v1461_v33, %v1477_v32 }
 0x16c   : > { %v1131_v38 = vpop.permute.xlu0 %1130  ;;  %v1565_v60 = vrot.slane %v1551_v24, %v4550_v17  ;;  %v1495_v52 = vcombine.high %v1429_v31, %v1445_v30  ;;  %v1527_v58 = vcombine.high %v1461_v33, %v1477_v32  ;;  %v1695_v24 = vpop.permute.xlu1 %1694 }
 0x16d   : > { %v1582_v5 = vcombine.low %v1127_v45, %v1131_v38  ;;  %v1502_v51 = vrot.slane %v1494_v21, %v4593_v48 }
 0x16e   : > { %v1631_v44 = vcombine.high %v1565_v60, %v1581_v2  ;;  %v1509_v46 = vrot.slane %v1495_v52, %v4593_v48  ;;  %v1541_v11 = vrot.slane %v1527_v58, %v4593_v48 }
 0x16f   : > { %v1590_v55 = vrot.slane %v1582_v5, %v4550_v17  ;;  %1724 = vrot.lane.b32.xlu1 %v1409_v23, %s4420_s14  ;;  %v1583_v23 = vcombine.high %v1127_v45, %v1131_v38  ;;  %v1630_v45 = vcombine.low %v1565_v60, %v1581_v2 }
 0x170   : > { %v1645_v20 = vrot.slane %v1631_v44, %v4593_v48  ;;  %v1548_v31 = vcombine.low %v1509_v46, %v1541_v11  ;;  %v1549_v33 = vcombine.high %v1509_v46, %v1541_v11  ;;  %v1691_v35 = vpop.permute.xlu0 %1690 }
 0x171   : > { %v1646_v28 = vcombine.low %v1590_v55, %v1606_v22  ;;  %v1647_v5 = vcombine.high %v1590_v55, %v1606_v22  ;;  %v1638_v55 = vrot.slane %v1630_v45, %v4593_v48 }
 0x173   : > { %1754 = vrot.lane.b32.xlu1 %v1275_v27, %s4418_s12  ;;  %v5101_v29 = vrot.slane %v1646_v28, %v4593_v48  ;;  %v1599_v27 = vcombine.high %v5052_v9, %v1133_v59  ;;  %v1661_v34 = vrot.slane %v1647_v5, %v4593_v48  ;;  %v1405_v9 = vrot.slane %v1391_v36, %v4593_v48 }
 0x174   : > { %v1534_v59 = vrot.slane %v1526_v25, %v4593_v48  ;;  %v2030_v36 = vmul.f32 %v5011_v3, %v5011_v3  ;;  %v1707_v39 = vpop.permute.xlu0 %1706 }
 0x175   : > { %v1679_v19 = vcombine.high %v5094_v47, %v5101_v29  ;;  %v1678_v43 = vcombine.low %v5094_v47, %v5101_v29  ;;  %v1613_v41 = vrot.slane %v1599_v27, %v4550_v17  ;;  %v1680_v57 = vcombine.low %v1629_v37, %v1661_v34 }
 0x176   : > { %v1412_v8 = vcombine.low %v1373_v26, %v1405_v9  ;;  %v1546_v22 = vcombine.low %v1502_v51, %v1534_v59  ;;  %v1413_v42 = vcombine.high %v1373_v26, %v1405_v9  ;;  %v1547_v28 = vcombine.high %v1502_v51, %v1534_v59 }
 0x177   : > { %1710 = vrot.lane.b32.xlu1 %v1544_v40, %s4419_s13  ;;  %1696 = vrot.lane.b32.xlu0 %v1679_v19, %s4417_s11  ;;  %v1597_v40 = vrot.slane %v1583_v23, %v4550_v17  ;;  %v2040_v19 = vsel %vm1834_vm7, %v2030_v36, 0.0  ;;  %v1798_v9 = vsel %vm1043_vm0, %v1270_v62, %v1691_v35 }
 0x178   : > { %v2041_v27 = vrot.slane %v2040_v19, 4 }
 0x179   : > { %v1662_v38 = vcombine.low %v1597_v40, %v1613_v41 }
 0x17b   : > { %1770 = vrot.lane.b32.xlu1 %v1276_v53, %s4421_s20  ;;  %1756 = vrot.lane.b32.xlu0 %v1411_v18, %s4418_s12  ;;  %v1681_v53 = vcombine.high %v1629_v37, %v1661_v34  ;;  %v1670_v15 = vrot.slane %v1662_v38, %v4593_v48  ;;  %v1723_v18 = vpop.permute.xlu0 %1722  ;;  %v2042_v37 = vadd.f32 %v2041_v27, %v2040_v19 }
 0x17d   : > { %v1682_v12 = vcombine.low %v1638_v55, %v1670_v15  ;;  %v2043_v34 = vrot.slane %v2042_v37, 2 }
 0x17f   : > { %1726 = vrot.lane.b32.xlu1 %v1545_v54, %s4420_s14  ;;  %1712 = vrot.lane.b32.xlu0 %v1680_v57, %s4419_s13  ;;  %v1663_v54 = vcombine.high %v1597_v40, %v1613_v41  ;;  %v1739_v25 = vpop.permute.xlu0 %1738  ;;  %v2044_v2 = vadd.f32 %v2043_v34, %v2042_v37  ;;  %v1802_v57 = vsel %vm1048_vm1, %v1798_v9, %v1707_v39  ;;  %s4038_s13 = sld [smem:[#allocation2 + $0x1]] }
 0x180   : > { %v1806_v38 = vsel %vm1053_vm2, %v1802_v57, %v1723_v18 }
 0x181   : > { %v1677_v5 = vrot.slane %v1663_v54, %v4593_v48  ;;  %v2045_v60 = vrot.slane %v2044_v2, 1 }
 0x183   : > { %1786 = vrot.lane.b32.xlu1 %v1277_v61, %s4423_s24  ;;  %1772 = vrot.lane.b32.xlu0 %v1412_v8, %s4421_s20  ;;  %v1683_v61 = vcombine.high %v1638_v55, %v1670_v15  ;;  %v1684_v30 = vcombine.low %v1645_v20, %v1677_v5  ;;  %v1685_v32 = vcombine.high %v1645_v20, %v1677_v5 }
 0x184   : > { %v2046_v51 = vadd.f32 %v2045_v60, %v2044_v2 }
 0x186   : > { %v2062_v8 = vmax.f32 %v2046_v51, 1e-24 }
 0x187   : > { %1742 = vrot.lane.b32.xlu1 %v1546_v22, %s4422_s23  ;;  %1728 = vrot.lane.b32.xlu0 %v1681_v53, %s4420_s14  ;;  %v1810_v22 = vsel %vm1058_vm3, %v1806_v38, %v1739_v25  ;;  %s4430_s14 = smov 112  }
 0x188   : > { %4316 = vrsqrt.f32 %v2062_v8 }
 0x18b   : > { %1744 = vrot.lane.b32.xlu1 %v1682_v12, %s4422_s23  ;;  %1788 = vrot.lane.b32.xlu0 %v1413_v42, %s4423_s24  ;;  %v1800_v12 = vsel %vm1043_vm0, %v1542_v63, %v1695_v24  ;;  %s4432_s23 = smov 96  }
 0x18f   : > { %1760 = vrot.lane.b32.xlu1 %v1683_v61, %s4418_s12  ;;  %1758 = vrot.lane.b32.xlu0 %v1547_v28, %s4418_s12  ;;  %s289_s12 = sld [smem:[#allocation2]] }
 0x192   : > { %v4317_v28 = vpop.eup %4316 }
 0x193   : > { %1776 = vrot.lane.b32.xlu1 %v1684_v30, %s4421_s20  ;;  %1774 = vrot.lane.b32.xlu0 %v1548_v31, %s4421_s20  ;;  %v2070_v31 = vmul.f32 %v4317_v28, %v5011_v3  ;;  %s4431_s20 = smov 104  }
 0x197   : > { %1792 = vrot.lane.b32.xlu1 %v1685_v32, %s4423_s24  ;;  %1790 = vrot.lane.b32.xlu0 %v1549_v33, %s4423_s24  ;;  %s4433_s24 = smov 88  }
 0x1d9   : > { %v1693_v23 = vpop.permute.xlu1 %1692  ;;  %v1741_v26 = vpop.permute.xlu0 %1740 }
 0x1da   : > { %v1799_v62 = vsel %vm1043_vm0, %v1406_v7, %v1693_v23 }
 0x1dd   : > { %v1709_v21 = vpop.permute.xlu1 %1708 }
 0x1de   : > { %v1803_v52 = vsel %vm1048_vm1, %v1799_v62, %v1709_v21 }
 0x1e1   : > { %v1725_v41 = vpop.permute.xlu1 %1724 }
 0x1e2   : > { %v1807_v13 = vsel %vm1053_vm2, %v1803_v52, %v1725_v41 }
 0x1e3   : > { %v1811_v46 = vsel %vm1058_vm3, %v1807_v13, %v1741_v26 }
 0x1e5   : > { %v1755_v40 = vpop.permute.xlu1 %1754 }
 0x1e6   : > { %v1814_v15 = vsel %vm1063_vm4, %v1810_v22, %v1755_v40 }
 0x1e9   : > { %v1711_v59 = vpop.permute.xlu1 %1710  ;;  %v1697_v45 = vpop.permute.xlu0 %1696 }
 0x1ea   : > { %v1804_v11 = vsel %vm1048_vm1, %v1800_v12, %v1711_v59  ;;  %v1801_v3 = vsel %vm1043_vm0, %v1678_v43, %v1697_v45 }
 0x1ed   : > { %v1771_v53 = vpop.permute.xlu1 %1770  ;;  %v1757_v55 = vpop.permute.xlu0 %1756 }
 0x1ee   : > { %v1818_v42 = vsel %vm1068_vm5, %v1814_v15, %v1771_v53  ;;  %v1815_v61 = vsel %vm1063_vm4, %v1811_v46, %v1757_v55 }
 0x1f1   : > { %v1727_v49 = vpop.permute.xlu1 %1726  ;;  %v1713_v50 = vpop.permute.xlu0 %1712 }
 0x1f2   : > { %v1808_v0 = vsel %vm1053_vm2, %v1804_v11, %v1727_v49  ;;  %v1805_v36 = vsel %vm1048_vm1, %v1801_v3, %v1713_v50 }
 0x1f5   : > { %v1787_v58 = vpop.permute.xlu1 %1786  ;;  %v1773_v44 = vpop.permute.xlu0 %1772 }
 0x1f6   : > { %v5186_v54 = vsel %vm1073_vm6, %v1818_v42, %v1787_v58  ;;  %v1819_v20 = vsel %vm1068_vm5, %v1815_v61, %v1773_v44 }
 0x1f7   : > { %4146 = vmatprep.mubr.msk.f32.mxu1 %vm1834_vm7, %v5186_v54 }
 0x1f9   : > { %v1743_v4 = vpop.permute.xlu1 %1742  ;;  %v1729_v7 = vpop.permute.xlu0 %1728 }
 0x1fa   : > { %v1812_v63 = vsel %vm1058_vm3, %v1808_v0, %v1743_v4  ;;  %v1809_v24 = vsel %vm1053_vm2, %v1805_v36, %v1729_v7 }
 0x1fd   : > { %v1745_v5 = vpop.permute.xlu1 %1744  ;;  %v1789_v30 = vpop.permute.xlu0 %1788 }
 0x1fe   : > { %v5202_v1 = vsel %vm1073_vm6, %v1819_v20, %v1789_v30  ;;  %v1813_v27 = vsel %vm1058_vm3, %v1809_v24, %v1745_v5 }
 0x1ff   : > { %4147 = vmatmul.mubr.msk.f32.vlgmr.msra.gmra.mrb[0].mxu1 %vm1834_vm7, %v5202_v1 }
 0x200   : > { %4158 = vmatpush3.msra.mxu1 %v2070_v31 }
 0x201   : > { %v1761_v32 = vpop.permute.xlu1 %1760  ;;  %v1759_v33 = vpop.permute.xlu0 %1758  ;;  %4167 = vmatprep.subr.mxu1 %v4424_v14 }
 0x202   : > { %v1816_v35 = vsel %vm1063_vm4, %v1812_v63, %v1759_v33  ;;  %v1817_v37 = vsel %vm1063_vm4, %v1813_v27, %v1761_v32 }
 0x205   : > { %v1777_v39 = vpop.permute.xlu1 %1776  ;;  %v1775_v19 = vpop.permute.xlu0 %1774 }
 0x206   : > { %v1820_v18 = vsel %vm1068_vm5, %v1816_v35, %v1775_v19  ;;  %v1821_v23 = vsel %vm1068_vm5, %v1817_v37, %v1777_v39  ;;  %v2031_v37 = vmul.f32 %v5019_v56, %v5019_v56 }
 0x209   : > { %v1793_v34 = vpop.permute.xlu1 %1792  ;;  %v1791_v47 = vpop.permute.xlu0 %1790 }
 0x20a   : > { %v5220_v29 = vsel %vm1073_vm6, %v1821_v23, %v1793_v34  ;;  %v5223_v43 = vsel %vm1073_vm6, %v1820_v18, %v1791_v47  ;;  %v2032_v18 = vmul.f32 %v5024_v16, %v5024_v16  ;;  %v2047_v47 = vsel %vm1834_vm7, %v2031_v37, 0.0 }
 0x20b   : > { %4149 = vmatprep.mubr.msk.f32.mxu1 %vm1834_vm7, %v5223_v43 }
 0x20c   : > { %4150 = vmatmul.mubr.msk.f32.gmra.mrb[2].mxu1 %vm1834_vm7, %v5220_v29  ;;  %v2054_v23 = vsel %vm1834_vm7, %v2032_v18, 0.0 }
 0x20d   : > { %4159 = vmatprep.mubr.msk.f32.mxu1 %vm4425_vm8, %v4424_v14  ;;  %v2055_v34 = vrot.slane %v2054_v23, 4 }
 0x21d   : > { %v4126_v21 = vpop.f32.mrb[0].mxu0 }
 0x21e   : > { %v2074_v25 = vmul.f32 %v4126_v21, %v4126_v21  ;;  %v1913_v2 = vpop.f32.mrb[1].mxu0 }
 0x21f   : > { %v2073_v41 = vmul.f32 %v1913_v2, %v1913_v2 }
 0x220   : > { %v2085_v26 = vsel %vm2077_vm9, %v2074_v25, 0.0  ;;  %v2056_v25 = vadd.f32 %v2055_v34, %v2054_v23 }
 0x221   : > { %v2086_v9 = vrot.slane %v2085_v26, 4  ;;  %v2078_v60 = vsel %vm2077_vm9, %v2073_v41, 0.0 }
 0x222   : > { %v2079_v40 = vrot.slane %v2078_v60, 4  ;;  %v4129_v57 = vpop.f32.mrb[2].mxu0  ;;  %v2057_v41 = vrot.slane %v2056_v25, 2 }
 0x223   : > { %v2087_v51 = vadd.f32 %v2086_v9, %v2085_v26  ;;  %v2076_v59 = vmul.f32 %v4129_v57, %v4129_v57  ;;  %v1923_v45 = vpop.f32.mrb[3].mxu0 }
 0x224   : > { %v2080_v38 = vadd.f32 %v2079_v40, %v2078_v60  ;;  %v2075_v8 = vmul.f32 %v1923_v45, %v1923_v45  ;;  %v2058_v9 = vadd.f32 %v2057_v41, %v2056_v25 }
 0x225   : > { %v2088_v22 = vrot.slane %v2087_v51, 2  ;;  %v2099_v53 = vsel %vm2077_vm9, %v2076_v59, 0.0 }
 0x226   : > { %v2081_v55 = vrot.slane %v2080_v38, 2  ;;  %v2100_v15 = vrot.slane %v2099_v53, 4  ;;  %v2092_v49 = vsel %vm2077_vm9, %v2075_v8, 0.0  ;;  %v2059_v40 = vrot.slane %v2058_v9, 1 }
 0x227   : > { %v2089_v50 = vadd.f32 %v2088_v22, %v2087_v51  ;;  %v2093_v62 = vrot.slane %v2092_v49, 4 }
 0x228   : > { %v2082_v42 = vadd.f32 %v2081_v55, %v2080_v38  ;;  %v2101_v52 = vadd.f32 %v2100_v15, %v2099_v53  ;;  %v2060_v51 = vadd.f32 %v2059_v40, %v2058_v9 }
 0x229   : > { %v2090_v58 = vrot.slane %v2089_v50, 1  ;;  %v2094_v44 = vadd.f32 %v2093_v62, %v2092_v49 }
 0x22a   : > { %v2083_v12 = vrot.slane %v2082_v42, 1  ;;  %v2102_v13 = vrot.slane %v2101_v52, 2 }
 0x22b   : > { %v2091_v4 = vadd.f32 %v2090_v58, %v2089_v50  ;;  %v2095_v7 = vrot.slane %v2094_v44, 2  ;;  %v2538_v58 = vstv %s289_s12 }
 0x22c   : > { %v2084_v28 = vadd.f32 %v2083_v12, %v2082_v42  ;;  %v2103_v46 = vadd.f32 %v2102_v13, %v2101_v52  ;;  %v2543_v12 = vstv %s4038_s13 }
 0x22d   : > { %v2107_v11 = vmax.f32 %v2091_v4, 1e-24  ;;  %v2096_v61 = vadd.f32 %v2095_v7, %v2094_v44 }
 0x22e   : > { %v2106_v20 = vmax.f32 %v2084_v28, 1e-24  ;;  %v2104_v5 = vrot.slane %v2103_v46, 1 }
 0x22f   : > { %4318 = vrsqrt.f32 %v2107_v11  ;;  %v2097_v30 = vrot.slane %v2096_v61, 1 }
 0x230   : > { %v2105_v31 = vadd.f32 %v2104_v5, %v2103_v46  ;;  %4320 = vrsqrt.f32 %v2106_v20 }
 0x231   : > { %v2098_v0 = vadd.f32 %v2097_v30, %v2096_v61 }
 0x232   : > { %v2109_v63 = vmax.f32 %v2105_v31, 1e-24 }
 0x233   : > { %v2108_v32 = vmax.f32 %v2098_v0, 1e-24 }
 0x234   : > { %4322 = vrsqrt.f32 %v2109_v63 }
 0x235   : > { %4324 = vrsqrt.f32 %v2108_v32 }
 0x239   : > { %v4319_v33 = vpop.eup %4318 }
 0x23a   : > { %v2115_v3 = vmul.f32 %v4319_v33, %v4126_v21  ;;  %v4321_v35 = vpop.eup %4320  ;;  %v2048_v21 = vrot.slane %v2047_v47, 4 }
 0x23b   : > { %v2114_v39 = vmul.f32 %v4321_v35, %v1913_v2 }
 0x23c   : > { %2223 = vxpose.xlu0.b32.start.end [1/1] (short) (narrow) %v2115_v3, 8  ;;  %v2049_v2 = vadd.f32 %v2048_v21, %v2047_v47 }
 0x23e   : > { %v4323_v36 = vpop.eup %4322  ;;  %v2050_v26 = vrot.slane %v2049_v2, 2 }
 0x23f   : > { %v4325_v19 = vpop.eup %4324  ;;  %v2117_v24 = vmul.f32 %v4323_v36, %v4129_v57 }
 0x240   : > { %2118 = vxpose.xlu0.b32.start.end [1/1] (short) (narrow) %v2114_v39, 8  ;;  %v2116_v27 = vmul.f32 %v4325_v19, %v1923_v45  ;;  %v2051_v60 = vadd.f32 %v2050_v26, %v2049_v2  ;;  %v2064_v45 = vmax.f32 %v2060_v51, 1e-24 }
 0x241   : > { %2433 = vxpose.xlu1.b32.start.end [1/1] (short) (narrow) %v2117_v24, 8 }
 0x242   : > { %v2052_v57 = vrot.slane %v2051_v60, 1  ;;  %4326 = vrsqrt.f32 %v2064_v45 }
 0x244   : > { %2328 = vxpose.xlu0.b32.start.end [1/1] (short) (narrow) %v2116_v27, 8  ;;  %v2053_v59 = vadd.f32 %v2052_v57, %v2051_v60 }
 0x246   : > { %v2063_v38 = vmax.f32 %v2053_v59, 1e-24 }
 0x248   : > { %4328 = vrsqrt.f32 %v2063_v38 }
 0x24c   : > { %v4327_v8 = vpop.eup %4326 }
 0x24d   : > { %v2072_v22 = vmul.f32 %v4327_v8, %v5024_v16 }
 0x252   : > { %v4329_v55 = vpop.eup %4328 }
 0x253   : > { %v2071_v15 = vmul.f32 %v4329_v55, %v5019_v56 }
 0x2bc   : > { %v2239_v53 = vpop.trf.xlu0 }
 0x2bd   : > { %4160 = vmatmul.mubr.msk.f32.vlgmr.msra.gmra.mrb[4].mxu1 %vm1043_vm0, %v2239_v53 }
 0x2be   : > { %4168 = vmatpush3.msra.mxu1 %v2072_v22  ;;  %4169 = vmatprep.mubr.msk.f32.mxu1 %vm4425_vm8, %v4424_v14 }
 0x2bf   : > { %4177 = vmatprep.subr.mxu1 %v4424_v14 }
 0x2c0   : > { %v2134_v49 = vpop.trf.xlu0 }
 0x2c1   : > { %4155 = vmatmul.mubr.msk.f32.vlgmr.msra.gmra.mrb[4].mxu0 %vm1043_vm0, %v2134_v49  ;;  %v2449_v50 = vpop.trf.xlu1 }
 0x2c2   : > { %4163 = vmatpush3.msra.mxu0 %v2071_v15  ;;  %4170 = vmatmul.mubr.msk.f32.vlgmr.msra.gmra.mrb[6].mxu1 %vm1043_vm0, %v2449_v50 }
 0x2c3   : > { %4164 = vmatprep.mubr.msk.f32.mxu0 %vm4425_vm8, %v4424_v14  ;;  %4179 = vmatprep.mubr.msk.f32.mxu1 %vm4425_vm8, %v4424_v14 }
 0x2c4   : > { %v2344_v16 = vpop.trf.xlu0  ;;  %4172 = vmatprep.subr.mxu0 %v4424_v14 }
 0x2c5   : > { %4165 = vmatmul.mubr.msk.f32.vlgmr.msra.gmra.mrb[6].mxu0 %vm1043_vm0, %v2344_v16 }
 0x2c6   : > { %4174 = vmatprep.mubr.msk.f32.mxu0 %vm4425_vm8, %v4424_v14 }
 0x2d2   : > { %v5257_v56 = vpop.f32.mrb[0].mxu1 }
 0x2d3   : > { %v5259_v62 = vpop.f32.mrb[1].mxu1 }
 0x2df   : > { %v5261_v42 = vpop.f32.mrb[2].mxu1 }
 0x2e0   : > { %v5263_v52 = vpop.f32.mrb[3].mxu1 }
 0x390   : > { %v2324_v44 = vpop.f32.mrb[4].mxu1 }
 0x391   : > { %v2540_v13 = vmul.f32 %v2538_v58, %v2324_v44  ;;  %v4161_v4 = vpop.f32.mrb[5].mxu1 }
 0x393   : > { %v2545_v7 = vadd.f32 %v2543_v12, %v2540_v13 }
 0x394   : > { %v2219_v28 = vpop.f32.mrb[4].mxu0 }
 0x395   : > { %v4052_v46 = vmul.f32 -1.442695, %v2545_v7  ;;  %v2539_v11 = vmul.f32 %v2538_v58, %v2219_v28  ;;  %v2534_v61 = vpop.f32.mrb[6].mxu1  ;;  %v4156_v20 = vpop.f32.mrb[5].mxu0 }
 0x396   : > { %v2542_v5 = vmul.f32 %v2538_v58, %v2534_v61  ;;  %v4171_v30 = vpop.f32.mrb[7].mxu1 }
 0x397   : > { %4330 = vpow2.f32 %v4052_v46  ;;  %v2544_v31 = vadd.f32 %v2543_v12, %v2539_v11 }
 0x398   : > { %v2547_v0 = vadd.f32 %v2543_v12, %v2542_v5  ;;  %v2429_v63 = vpop.f32.mrb[6].mxu0 }
 0x399   : > { %v4051_v32 = vmul.f32 -1.442695, %v2544_v31  ;;  %v2541_v33 = vmul.f32 %v2538_v58, %v2429_v63  ;;  %v4166_v3 = vpop.f32.mrb[7].mxu0 }
 0x39a   : > { %v4054_v35 = vmul.f32 -1.442695, %v2547_v0 }
 0x39b   : > { %4332 = vpow2.f32 %v4051_v32  ;;  %v2546_v36 = vadd.f32 %v2543_v12, %v2541_v33 }
 0x39c   : > { %4334 = vpow2.f32 %v4054_v35 }
 0x39d   : > { %v4053_v39 = vmul.f32 -1.442695, %v2546_v36 }
 0x39f   : > { %4336 = vpow2.f32 %v4053_v39 }
 0x3a1   : > { %v4331_v19 = vpop.eup %4330 }
 0x3a2   : > { %v2561_v24 = vadd.f32 1.0, %v4331_v19 }
 0x3a4   : > { %4338 = vrcp.f32 %v2561_v24 }
 0x3a5   : > { %v4333_v27 = vpop.eup %4332 }
 0x3a6   : > { %v4335_v18 = vpop.eup %4334  ;;  %v2560_v37 = vadd.f32 1.0, %v4333_v27 }
 0x3a7   : > { %v2563_v23 = vadd.f32 1.0, %v4335_v18 }
 0x3a8   : > { %4340 = vrcp.f32 %v2560_v37 }
 0x3a9   : > { %v4337_v34 = vpop.eup %4336  ;;  %4342 = vrcp.f32 %v2563_v23 }
 0x3aa   : > { %v2562_v47 = vadd.f32 1.0, %v4337_v34 }
 0x3ac   : > { %4344 = vrcp.f32 %v2562_v47 }
 0x3ae   : > { %v5265_v21 = vpop.eup %4338 }
 0x3af   : > { %v2582_v25 = vsel %vm2574_vm10, %v5265_v21, -inf }
 0x3b0   : > { %v2583_v2 = vrot.slane %v2582_v25, 4 }
 0x3b2   : > { %v5269_v41 = vpop.eup %4340  ;;  %v2584_v26 = vmax.f32 %v2582_v25, %v2583_v2 }
 0x3b3   : > { %v5271_v9 = vpop.eup %4342  ;;  %v2575_v60 = vsel %vm2574_vm10, %v5269_v41, -inf }
 0x3b4   : > { %v2585_v40 = vrot.slane %v2584_v26, 2  ;;  %v2576_v57 = vrot.slane %v2575_v60, 4  ;;  %v2596_v51 = vsel %vm2574_vm10, %v5271_v9, -inf }
 0x3b5   : > { %v2597_v59 = vrot.slane %v2596_v51, 4 }
 0x3b6   : > { %v5277_v45 = vpop.eup %4344  ;;  %v2586_v38 = vmax.f32 %v2584_v26, %v2585_v40  ;;  %v2577_v8 = vmax.f32 %v2575_v60, %v2576_v57 }
 0x3b7   : > { %v2598_v22 = vmax.f32 %v2596_v51, %v2597_v59  ;;  %v2589_v53 = vsel %vm2574_vm10, %v5277_v45, -inf }
 0x3b8   : > { %v2587_v55 = vrot.slane %v2586_v38, 1  ;;  %v2578_v15 = vrot.slane %v2577_v8, 2  ;;  %v2590_v49 = vrot.slane %v2589_v53, 4 }
 0x3b9   : > { %v2599_v50 = vrot.slane %v2598_v22, 2 }
 0x3ba   : > { %v2588_v16 = vmax.f32 %v2586_v38, %v2587_v55  ;;  %v2579_v58 = vmax.f32 %v2577_v8, %v2578_v15  ;;  %v2591_v44 = vmax.f32 %v2589_v53, %v2590_v49 }
 0x3bb   : > { %v2600_v12 = vmax.f32 %v2598_v22, %v2599_v50 }
 0x3bc   : > { %vm2604_vm11 = vcmp.eq.f32.partialorder %v5265_v21, %v2588_v16  ;;  %v2580_v13 = vrot.slane %v2579_v58, 1  ;;  %v2592_v4 = vrot.slane %v2591_v44, 2 }
 0x3bd   : > { %v2608_v7 = vsel %vm2604_vm11, %v4537_v10, 4  ;;  %v2601_v28 = vrot.slane %v2600_v12, 1 }
 0x3be   : > { %v2621_v46 = vsel %vm2574_vm10, %v2608_v7, 2147483647  ;;  %v2581_v11 = vmax.f32 %v2579_v58, %v2580_v13  ;;  %v2593_v61 = vmax.f32 %v2591_v44, %v2592_v4 }
 0x3bf   : > { %v2622_v20 = vrot.slane %v2621_v46, 4  ;;  %v2602_v5 = vmax.f32 %v2600_v12, %v2601_v28 }
 0x3c0   : > { %vm2603_vm12 = vcmp.eq.f32.partialorder %v5269_v41, %v2581_v11  ;;  %v2594_v30 = vrot.slane %v2593_v61, 1 }
 0x3c1   : > { %vm2623_vm13 = vcmp.lt.s32.totalorder %v2621_v46, %v2622_v20  ;;  %v2607_v31 = vsel %vm2603_vm12, %v4537_v10, 4  ;;  %vm2606_vm14 = vcmp.eq.f32.partialorder %v5271_v9, %v2602_v5 }
 0x3c2   : > { %v2624_v0 = vsel %vm2623_vm13, %v2621_v46, %v2622_v20  ;;  %v2611_v63 = vsel %vm2574_vm10, %v2607_v31, 2147483647  ;;  %v2610_v32 = vsel %vm2606_vm14, %v4537_v10, 4  ;;  %v2595_v33 = vmax.f32 %v2593_v61, %v2594_v30 }
 0x3c3   : > { %v2625_v3 = vrot.slane %v2624_v0, 2  ;;  %v2612_v35 = vrot.slane %v2611_v63, 4  ;;  %v2641_v36 = vsel %vm2574_vm10, %v2610_v32, 2147483647 }
 0x3c4   : > { %v2642_v39 = vrot.slane %v2641_v36, 4  ;;  %vm2605_vm15 = vcmp.eq.f32.partialorder %v5277_v45, %v2595_v33 }
 0x3c5   : > { %vm2626_vm2 = vcmp.lt.s32.totalorder %v2624_v0, %v2625_v3  ;;  %vm2613_vm3 = vcmp.lt.s32.totalorder %v2611_v63, %v2612_v35  ;;  %v2609_v19 = vsel %vm2605_vm15, %v4537_v10, 4 }
 0x3c6   : > { %v2627_v24 = vsel %vm2626_vm2, %v2624_v0, %v2625_v3  ;;  %v2614_v27 = vsel %vm2613_vm3, %v2611_v63, %v2612_v35  ;;  %vm2643_vm4 = vcmp.lt.s32.totalorder %v2641_v36, %v2642_v39  ;;  %v2631_v18 = vsel %vm2574_vm10, %v2609_v19, 2147483647 }
 0x3c7   : > { %v2628_v37 = vrot.slane %v2627_v24, 1  ;;  %v2615_v23 = vrot.slane %v2614_v27, 2  ;;  %v2644_v34 = vsel %vm2643_vm4, %v2641_v36, %v2642_v39  ;;  %v2632_v47 = vrot.slane %v2631_v18, 4 }
 0x3c8   : > { %v2645_v25 = vrot.slane %v2644_v34, 2 }
 0x3c9   : > { %vm2629_vm5 = vcmp.lt.s32.totalorder %v2627_v24, %v2628_v37  ;;  %vm2616_vm6 = vcmp.lt.s32.totalorder %v2614_v27, %v2615_v23  ;;  %vm2633_vm9 = vcmp.lt.s32.totalorder %v2631_v18, %v2632_v47 }
 0x3ca   : > { %v2630_v2 = vsel %vm2629_vm5, %v2627_v24, %v2628_v37  ;;  %v2617_v26 = vsel %vm2616_vm6, %v2614_v27, %v2615_v23  ;;  %vm2646_vm11 = vcmp.lt.s32.totalorder %v2644_v34, %v2645_v25  ;;  %v2634_v60 = vsel %vm2633_vm9, %v2631_v18, %v2632_v47 }
 0x3cb   : > { %vm2652_vm12 = vcmp.eq.s32.totalorder %v4537_v10, %v2630_v2  ;;  %v2618_v40 = vrot.slane %v2617_v26, 1  ;;  %v2647_v57 = vsel %vm2646_vm11, %v2644_v34, %v2645_v25  ;;  %v2635_v51 = vrot.slane %v2634_v60, 2 }
 0x3cc   : > { %v5295_v59 = vsel %vm2652_vm12, %v5265_v21, 0.0  ;;  %v2648_v38 = vrot.slane %v2647_v57, 1  ;;  %v4429_v34 = vmov 3   ;;  %v5350_v47 = vsub.s32 1, %v4537_v10 }
 0x3cd   : > { %4178 = vmatpush3.xpose.msk.msra.mxu1 %vm1834_vm7, %v5295_v59  ;;  %v2662_v8 = vsel %vm2574_vm10, %v5295_v59, 0.0  ;;  %vm2619_vm13 = vcmp.lt.s32.totalorder %v2617_v26, %v2618_v40  ;;  %vm2636_vm14 = vcmp.lt.s32.totalorder %v2634_v60, %v2635_v51  ;;  %v5353_v2 = vsub.s32 0, %v4537_v10 }
 0x3ce   : > { %2663 = vadd.xlane.f32.xlu0 %v2662_v8  ;;  %v2620_v22 = vsel %vm2619_vm13, %v2617_v26, %v2618_v40  ;;  %4187 = vmatprep.subr.mxu1 %v4424_v14  ;;  %vm2649_vm15 = vcmp.lt.s32.totalorder %v2647_v57, %v2648_v38  ;;  %v2637_v53 = vsel %vm2636_vm14, %v2634_v60, %v2635_v51  ;;  %v5356_v26 = vsub.s32 2, %v4537_v10 }
 0x3cf   : > { %vm2651_vm2 = vcmp.eq.s32.totalorder %v4537_v10, %v2620_v22  ;;  %v2650_v55 = vsel %vm2649_vm15, %v2647_v57, %v2648_v38  ;;  %v2638_v21 = vrot.slane %v2637_v53, 1  ;;  %v3094_v60 = vrot.slane %v5295_v59, %v5350_v47 }
 0x3d0   : > { %4180 = vmatmul.mubr.msk.f32.vlgmr.msra.gmra.mrb[8].mxu1 %vm1834_vm7, %v5202_v1  ;;  %v5306_v15 = vsel %vm2651_vm2, %v5269_v41, 0.0  ;;  %vm2654_vm3 = vcmp.eq.s32.totalorder %v4537_v10, %v2650_v55  ;;  %v3058_v40 = vrot.slane %v5295_v59, %v5353_v2  ;;  %v3134_v51 = vrot.slane %v5295_v59, %v5356_v26 }
 0x3d1   : > { %4173 = vmatpush3.xpose.msk.msra.mxu0 %vm1834_vm7, %v5306_v15  ;;  %v5312_v49 = vsel %vm2654_vm3, %v5271_v9, 0.0  ;;  %4189 = vmatprep.mubr.msk.f32.mxu1 %vm4425_vm8, %v4424_v14  ;;  %vm2639_vm4 = vcmp.lt.s32.totalorder %v2637_v53, %v2638_v21  ;;  %v2659_v50 = vsel %vm2574_vm10, %v5306_v15, 0.0  ;;  %v5365_v8 = vsub.s32 3, %v4537_v10 }
 0x3d2   : > { %4188 = vmatpush3.xpose.msk.msra.mxu1 %vm1834_vm7, %v5312_v49  ;;  %v2668_v1 = vsel %vm2574_vm10, %v5312_v49, 0.0  ;;  %4182 = vmatprep.subr.mxu0 %v4424_v14  ;;  %v2640_v41 = vsel %vm2639_vm4, %v2637_v53, %v2638_v21 }
 0x3d3   : > { %2669 = vadd.xlane.f32.xlu1 %v2668_v1  ;;  %vm2653_vm5 = vcmp.eq.s32.totalorder %v4537_v10, %v2640_v41  ;;  %v3174_v21 = vrot.slane %v5295_v59, %v5365_v8  ;;  %v3066_v59 = vrot.slane %v5312_v49, %v5353_v2 }
 0x3d4   : > { %4175 = vmatmul.mubr.msk.f32.vlgmr.msra.gmra.mrb[8].mxu0 %vm1834_vm7, %v5186_v54  ;;  %v5325_v9 = vsel %vm2653_vm5, %v5277_v45, 0.0  ;;  %v4426_v54 = vmov 0   ;;  %v2972_v45 = vand.u32 127, %v392_v6 }
 0x3d5   : > { %4183 = vmatpush3.xpose.msk.msra.mxu0 %vm1834_vm7, %v5325_v9  ;;  %4190 = vmatmul.mubr.msk.f32.vlgmr.msra.gmra.mrb[10].mxu1 %vm1834_vm7, %v5220_v29  ;;  %v2665_v16 = vsel %vm2574_vm10, %v5325_v9, 0.0 }
 0x3d6   : > { %4184 = vmatprep.mubr.msk.f32.mxu0 %vm4425_vm8, %v4424_v14  ;;  %2666 = vadd.xlane.f32.xlu0 %v2665_v16  ;;  %v2975_v29 = vsub.s32 %v2972_v45, %v4537_v10  ;;  %v3102_v45 = vrot.slane %v5312_v49, %v5350_v47 }
 0x3d7   : > { %2660 = vadd.xlane.f32.xlu1 %v2659_v50  ;;  %4298 = vset.pattern.permute.xlu0 %v4426_v54 }
 0x3d8   : > { %4185 = vmatmul.mubr.msk.f32.vlgmr.msra.gmra.mrb[10].mxu0 %vm1834_vm7, %v5223_v43  ;;  %4297 = vset.pattern.permute.xlu1 %v4426_v54 }
 0x45b   : > { %v2664_v58 = vpop.xlane.xlu0 %2663 }
 0x45c   : > { %v2672_v44 = vadd.f32 1.0, %v2664_v58 }
 0x45e   : > { %v2980_v13 = vrot.slane %v2672_v44, %v2975_v29 }
 0x460   : > { %v2670_v12 = vpop.xlane.xlu1 %2669  ;;  %4346 = vrcp.f32 %v2980_v13 }
 0x461   : > { %v2674_v4 = vadd.f32 1.0, %v2670_v12 }
 0x463   : > { %v2988_v28 = vrot.slane %v2674_v4, %v2975_v29  ;;  %v2667_v46 = vpop.xlane.xlu0 %2666 }
 0x464   : > { %v2661_v14 = vpop.xlane.xlu1 %2660  ;;  %v2673_v11 = vadd.f32 1.0, %v2667_v46 }
 0x465   : > { %v2671_v7 = vadd.f32 1.0, %v2661_v14  ;;  %4348 = vrcp.f32 %v2988_v28  ;;  %v3182_v14 = vrot.slane %v5312_v49, %v5365_v8 }
 0x466   : > { %v2984_v20 = vrot.slane %v2673_v11, %v2975_v29 }
 0x467   : > { %v2976_v43 = vrot.slane %v2671_v7, %v2975_v29  ;;  %v3142_v29 = vrot.slane %v5312_v49, %v5356_v26  ;;  %v3054_v49 = vrot.slane %v5306_v15, %v5353_v2 }
 0x469   : > { %4350 = vrcp.f32 %v2976_v43 }
 0x46a   : > { %v4347_v30 = vpop.eup %4346  ;;  %4352 = vrcp.f32 %v2984_v20  ;;  %v3090_v20 = vrot.slane %v5306_v15, %v5350_v47 }
 0x46f   : > { %v4349_v36 = vpop.eup %4348 }
 0x473   : > { %v4351_v18 = vpop.eup %4350 }
 0x474   : > { %v4353_v23 = vpop.eup %4352 }
 0x4a3   : > { %v2817_v61 = vpop.f32.mrb[8].mxu1 }
 0x4a4   : > { %v2818_v6 = vadd.f32 %v5257_v56, %v2817_v61  ;;  %v4181_v5 = vpop.f32.mrb[9].mxu1  ;;  %v4427_v56 = vmov 1  }
 0x4a5   : > { %v3130_v5 = vrot.slane %v5306_v15, %v5356_v26 }
 0x4a6   : > { %v3026_v31 = vmul.f32 %v4347_v30, %v2818_v6 }
 0x4a7   : > { %v2744_v0 = vpop.f32.mrb[8].mxu0 }
 0x4a8   : > { %v2745_v63 = vadd.f32 %v2744_v0, %v5259_v62  ;;  %v4176_v32 = vpop.f32.mrb[9].mxu0  ;;  %v2963_v33 = vpop.f32.mrb[10].mxu1  ;;  %3038 = vperm.xlu1 %4297, %v3026_v31   ;;  %v4428_v62 = vmov 2  }
 0x4a9   : > { %v2964_v3 = vadd.f32 %v5261_v42, %v2963_v33  ;;  %v4191_v35 = vpop.f32.mrb[11].mxu1  ;;  %v3170_v32 = vrot.slane %v5306_v15, %v5365_v8  ;;  %v3098_v15 = vrot.slane %v5325_v9, %v5350_v47 }
 0x4aa   : > { %v3024_v37 = vmul.f32 %v4351_v18, %v2745_v63 }
 0x4ab   : > { %v3030_v39 = vmul.f32 %v4349_v36, %v2964_v3  ;;  %v2890_v19 = vpop.f32.mrb[10].mxu0 }
 0x4ac   : > { %v2891_v24 = vadd.f32 %v2890_v19, %v5263_v52  ;;  %v4186_v27 = vpop.f32.mrb[11].mxu0  ;;  %4299 = vset.pattern.permute.xlu1 %v4427_v56  ;;  %v3062_v19 = vrot.slane %v5325_v9, %v5353_v2 }
 0x4ad   : > { %3048 = vperm.xlu0 %4298, %v3030_v39   ;;  %3076 = vperm.xlu1 %4299, %v3026_v31  }
 0x4ae   : > { %v3028_v42 = vmul.f32 %v4353_v23, %v2891_v24 }
 0x4b1   : > { %4306 = vset.pattern.permute.xlu0 %v4427_v56  ;;  %4300 = vset.pattern.permute.xlu1 %v4428_v62 }
 0x4b2   : > { %3072 = vperm.xlu0 %4306, %v3024_v37   ;;  %3116 = vperm.xlu1 %4300, %v3026_v31  }
 0x4b6   : > { %4311 = vset.pattern.permute.xlu0 %v4428_v62  ;;  %4301 = vset.pattern.permute.xlu1 %v4429_v34 }
 0x4b7   : > { %3156 = vperm.xlu1 %4301, %v3026_v31   ;;  %3120 = vperm.xlu0 %4311, %v3028_v42  }
 0x4bb   : > { %4302 = vset.pattern.permute.xlu1 %v4427_v56  ;;  %4313 = vset.pattern.permute.xlu0 %v4429_v34 }
 0x4bc   : > { %3084 = vperm.xlu1 %4302, %v3030_v39  }
 0x4c0   : > { %4303 = vset.pattern.permute.xlu1 %v4428_v62 }
 0x4c1   : > { %3124 = vperm.xlu1 %4303, %v3030_v39  }
 0x4c5   : > { %4304 = vset.pattern.permute.xlu1 %v4429_v34 }
 0x4c6   : > { %3164 = vperm.xlu1 %4304, %v3030_v39  }
 0x4ca   : > { %4305 = vset.pattern.permute.xlu1 %v4426_v54 }
 0x4cb   : > { %3033 = vperm.xlu1 %4305, %v3024_v37  }
 0x4cf   : > { %4307 = vset.pattern.permute.xlu1 %v4428_v62 }
 0x4d0   : > { %3112 = vperm.xlu1 %4307, %v3024_v37  }
 0x4d4   : > { %4308 = vset.pattern.permute.xlu1 %v4429_v34 }
 0x4d5   : > { %3152 = vperm.xlu1 %4308, %v3024_v37  }
 0x4d9   : > { %4309 = vset.pattern.permute.xlu1 %v4426_v54 }
 0x4da   : > { %3043 = vperm.xlu1 %4309, %v3028_v42  }
 0x4de   : > { %4310 = vset.pattern.permute.xlu1 %v4427_v56  ;;  %v3138_v56 = vrot.slane %v5325_v9, %v5356_v26 }
 0x4df   : > { %3080 = vperm.xlu1 %4310, %v3028_v42  }
 0x4e3   : > { %4312 = vset.pattern.permute.xlu1 %v4429_v34 }
 0x4e4   : > { %3160 = vperm.xlu1 %4312, %v3028_v42   ;;  %v3178_v42 = vrot.slane %v5325_v9, %v5365_v8 }
 0x527   : > { %v3039_v52 = vpop.permute.xlu1 %3038 }
 0x528   : > { %v3068_v22 = vmul.f32 %v3058_v40, %v3039_v52 }
 0x52c   : > { %v3077_v25 = vpop.permute.xlu1 %3076  ;;  %v3049_v10 = vpop.permute.xlu0 %3048 }
 0x52d   : > { %v3104_v57 = vmul.f32 %v3094_v60, %v3077_v25  ;;  %v3070_v12 = vmul.f32 %v3066_v59, %v3049_v10 }
 0x52f   : > { %v3108_v55 = vadd.f32 %v3104_v57, %v3068_v22 }
 0x531   : > { %v3117_v38 = vpop.permute.xlu1 %3116  ;;  %v3073_v61 = vpop.permute.xlu0 %3072 }
 0x532   : > { %v3144_v53 = vmul.f32 %v3134_v51, %v3117_v38  ;;  %v3103_v31 = vmul.f32 %v3090_v20, %v3073_v61 }
 0x534   : > { %v3148_v41 = vadd.f32 %v3144_v53, %v3108_v55 }
 0x536   : > { %v3157_v1 = vpop.permute.xlu1 %3156  ;;  %v3121_v24 = vpop.permute.xlu0 %3120 }
 0x537   : > { %v3184_v50 = vmul.f32 %v3174_v21, %v3157_v1  ;;  %v3145_v62 = vmul.f32 %v3138_v56, %v3121_v24 }
 0x539   : > { %v5369_v16 = vadd.f32 %v3184_v50, %v3148_v41 }
 0x53b   : > { %v3085_v54 = vpop.permute.xlu1 %3084  ;;  %3197 = vrot.lane.b32.xlu0 %v5369_v16, %s4414_s10 }
 0x53c   : > { %v3106_v58 = vmul.f32 %v3102_v45, %v3085_v54 }
 0x53e   : > { %v3110_v4 = vadd.f32 %v3106_v58, %v3070_v12 }
 0x53f   : > { %3209 = vrot.lane.b32.xlu0 %v5369_v16, %s4430_s14 }
 0x540   : > { %v3125_v44 = vpop.permute.xlu1 %3124 }
 0x541   : > { %v3146_v13 = vmul.f32 %v3142_v29, %v3125_v44 }
 0x543   : > { %3221 = vrot.lane.b32.xlu0 %v5369_v16, %s4431_s20  ;;  %v3150_v28 = vadd.f32 %v3146_v13, %v3110_v4 }
 0x545   : > { %v3165_v7 = vpop.permute.xlu1 %3164 }
 0x546   : > { %v3186_v46 = vmul.f32 %v3182_v14, %v3165_v7 }
 0x547   : > { %3233 = vrot.lane.b32.xlu0 %v5369_v16, %s4432_s23 }
 0x548   : > { %v5387_v43 = vadd.f32 %v3186_v46, %v3150_v28 }
 0x54a   : > { %v3034_v11 = vpop.permute.xlu1 %3033  ;;  %3201 = vrot.lane.b32.xlu1 %v5387_v43, %s4414_s10 }
 0x54b   : > { %3245 = vrot.lane.b32.xlu0 %v5369_v16, %s4433_s24  ;;  %v3067_v6 = vmul.f32 %v3054_v49, %v3034_v11 }
 0x54d   : > { %v3107_v63 = vadd.f32 %v3103_v31, %v3067_v6 }
 0x54e   : > { %3213 = vrot.lane.b32.xlu1 %v5387_v43, %s4430_s14 }
 0x54f   : > { %v3113_v30 = vpop.permute.xlu1 %3112  ;;  %3257 = vrot.lane.b32.xlu0 %v5369_v16, %s4434_s30 }
 0x550   : > { %v3143_v0 = vmul.f32 %v3130_v5, %v3113_v30 }
 0x552   : > { %3225 = vrot.lane.b32.xlu1 %v5387_v43, %s4431_s20  ;;  %v3147_v3 = vadd.f32 %v3143_v0, %v3107_v63 }
 0x553   : > { %3269 = vrot.lane.b32.xlu0 %v5369_v16, %s4435_s26 }
 0x554   : > { %v3153_v33 = vpop.permute.xlu1 %3152 }
 0x555   : > { %v3183_v35 = vmul.f32 %v3170_v32, %v3153_v33 }
 0x556   : > { %3237 = vrot.lane.b32.xlu1 %v5387_v43, %s4432_s23 }
 0x557   : > { %v5411_v36 = vadd.f32 %v3183_v35, %v3147_v3 }
 0x559   : > { %v3044_v39 = vpop.permute.xlu1 %3043  ;;  %3195 = vrot.lane.b32.xlu0 %v5411_v36, %s4414_s10 }
 0x55a   : > { %3249 = vrot.lane.b32.xlu1 %v5387_v43, %s4433_s24  ;;  %v3069_v18 = vmul.f32 %v3062_v19, %v3044_v39 }
 0x55d   : > { %3207 = vrot.lane.b32.xlu0 %v5411_v36, %s4430_s14 }
 0x55e   : > { %v3081_v27 = vpop.permute.xlu1 %3080  ;;  %3261 = vrot.lane.b32.xlu1 %v5387_v43, %s4434_s30 }
 0x55f   : > { %v3105_v37 = vmul.f32 %v3098_v15, %v3081_v27 }
 0x561   : > { %v3109_v23 = vadd.f32 %v3105_v37, %v3069_v18  ;;  %3219 = vrot.lane.b32.xlu0 %v5411_v36, %s4431_s20 }
 0x562   : > { %3273 = vrot.lane.b32.xlu1 %v5387_v43, %s4435_s26 }
 0x563   : > { %v3161_v34 = vpop.permute.xlu1 %3160  ;;  %v3149_v52 = vadd.f32 %v3145_v62, %v3109_v23 }
 0x564   : > { %v3185_v47 = vmul.f32 %v3178_v42, %v3161_v34 }
 0x565   : > { %3231 = vrot.lane.b32.xlu0 %v5411_v36, %s4432_s23 }
 0x566   : > { %v5435_v25 = vadd.f32 %v3185_v47, %v3149_v52 }
 0x568   : > { %3199 = vrot.lane.b32.xlu1 %v5435_v25, %s4414_s10  ;;  %s4035_s10 = sshll.u32 %s4399_s16, 1 }
 0x569   : > { %3243 = vrot.lane.b32.xlu0 %v5411_v36, %s4433_s24 }
 0x56c   : > { %3211 = vrot.lane.b32.xlu1 %v5435_v25, %s4430_s14 }
 0x56d   : > { %3255 = vrot.lane.b32.xlu0 %v5411_v36, %s4434_s30 }
 0x570   : > { %3223 = vrot.lane.b32.xlu1 %v5435_v25, %s4431_s20 }
 0x571   : > { %3267 = vrot.lane.b32.xlu0 %v5411_v36, %s4435_s26 }
 0x574   : > { %3235 = vrot.lane.b32.xlu1 %v5435_v25, %s4432_s23 }
 0x578   : > { %3247 = vrot.lane.b32.xlu1 %v5435_v25, %s4433_s24 }
 0x57c   : > { %3259 = vrot.lane.b32.xlu1 %v5435_v25, %s4434_s30 }
 0x580   : > { %3271 = vrot.lane.b32.xlu1 %v5435_v25, %s4435_s26 }
 0x5ad   : > { %v3198_v9 = vpop.permute.xlu0 %3197 }
 0x5b1   : > { %v3210_v2 = vpop.permute.xlu0 %3209 }
 0x5b2   : > { %v3415_v22 = vcombine.low %v5369_v16, %v3210_v2  ;;  %v3416_v12 = vcombine.high %v5369_v16, %v3210_v2 }
 0x5b4   : > { %v3423_v41 = vrot.slane %v3415_v22, %v4550_v17  ;;  %v3430_v20 = vrot.slane %v3416_v12, %v4550_v17 }
 0x5b5   : > { %v3222_v26 = vpop.permute.xlu0 %3221 }
 0x5b6   : > { %v3431_v51 = vcombine.low %v3198_v9, %v3222_v26  ;;  %v3432_v45 = vcombine.high %v3198_v9, %v3222_v26 }
 0x5b8   : > { %v3439_v53 = vrot.slane %v3431_v51, %v4550_v17  ;;  %v3446_v7 = vrot.slane %v3432_v45, %v4550_v17 }
 0x5b9   : > { %v3234_v60 = vpop.permute.xlu0 %3233 }
 0x5ba   : > { %v3479_v10 = vcombine.low %v3423_v41, %v3439_v53  ;;  %v3480_v28 = vcombine.high %v3423_v41, %v3439_v53  ;;  %v3495_v63 = vcombine.low %v3430_v20, %v3446_v7  ;;  %v3496_v27 = vcombine.high %v3430_v20, %v3446_v7 }
 0x5bc   : > { %v5457_v40 = vpop.permute.xlu1 %3201  ;;  %v3487_v46 = vrot.slane %v3479_v10, %v4593_v48  ;;  %v3494_v0 = vrot.slane %v3480_v28, %v4593_v48  ;;  %v3503_v56 = vrot.slane %v3495_v63, %v4593_v48  ;;  %v3510_v26 = vrot.slane %v3496_v27, %v4593_v48 }
 0x5bd   : > { %v3246_v57 = vpop.permute.xlu0 %3245 }
 0x5c0   : > { %v5459_v38 = vpop.permute.xlu1 %3213 }
 0x5c1   : > { %v3258_v8 = vpop.permute.xlu0 %3257  ;;  %v3687_v33 = vcombine.low %v5387_v43, %v5459_v38 }
 0x5c2   : > { %v3447_v55 = vcombine.low %v3234_v60, %v3258_v8  ;;  %v3448_v59 = vcombine.high %v3234_v60, %v3258_v8  ;;  %v3688_v8 = vcombine.high %v5387_v43, %v5459_v38 }
 0x5c3   : > { %v3695_v37 = vrot.slane %v3687_v33, %v4550_v17 }
 0x5c4   : > { %v5463_v21 = vpop.permute.xlu1 %3225  ;;  %v3455_v58 = vrot.slane %v3447_v55, %v4550_v17  ;;  %v3462_v11 = vrot.slane %v3448_v59, %v4550_v17  ;;  %v3702_v38 = vrot.slane %v3688_v8, %v4550_v17 }
 0x5c5   : > { %v3270_v1 = vpop.permute.xlu0 %3269  ;;  %v3703_v31 = vcombine.low %v5457_v40, %v5463_v21  ;;  %v3704_v60 = vcombine.high %v5457_v40, %v5463_v21 }
 0x5c6   : > { %v3463_v50 = vcombine.low %v3246_v57, %v3270_v1  ;;  %v3464_v54 = vcombine.high %v3246_v57, %v3270_v1 }
 0x5c7   : > { %v3711_v15 = vrot.slane %v3703_v31, %v4550_v17  ;;  %v3718_v40 = vrot.slane %v3704_v60, %v4550_v17 }
 0x5c8   : > { %v3471_v29 = vrot.slane %v3463_v50, %v4550_v17  ;;  %v3238_v44 = vpop.permute.xlu1 %3237  ;;  %v3478_v13 = vrot.slane %v3464_v54, %v4550_v17 }
 0x5c9   : > { %v3751_v52 = vcombine.low %v3695_v37, %v3711_v15  ;;  %v3752_v21 = vcombine.high %v3695_v37, %v3711_v15 }
 0x5ca   : > { %v3511_v4 = vcombine.low %v3455_v58, %v3471_v29  ;;  %v3512_v14 = vcombine.high %v3455_v58, %v3471_v29  ;;  %v3527_v5 = vcombine.low %v3462_v11, %v3478_v13  ;;  %v3528_v3 = vcombine.high %v3462_v11, %v3478_v13 }
 0x5cb   : > { %v3759_v1 = vrot.slane %v3751_v52, %v4593_v48  ;;  %v3766_v58 = vrot.slane %v3752_v21, %v4593_v48  ;;  %v3767_v29 = vcombine.low %v3702_v38, %v3718_v40 }
 0x5cc   : > { %v3519_v49 = vrot.slane %v3511_v4, %v4593_v48  ;;  %v3250_v61 = vpop.permute.xlu1 %3249  ;;  %v3526_v6 = vrot.slane %v3512_v14, %v4593_v48  ;;  %v3535_v35 = vrot.slane %v3527_v5, %v4593_v48  ;;  %v3542_v23 = vrot.slane %v3528_v3, %v4593_v48 }
 0x5cd   : > { %v3768_v14 = vcombine.high %v3702_v38, %v3718_v40  ;;  %v3775_v7 = vrot.slane %v3767_v29, %v4593_v48 }
 0x5ce   : > { %v3544_v16 = vcombine.high %v3487_v46, %v3519_v49  ;;  %v3543_v30 = vcombine.low %v3487_v46, %v3519_v49  ;;  %v3546_v39 = vcombine.high %v3494_v0, %v3526_v6  ;;  %v3545_v19 = vcombine.low %v3494_v0, %v3526_v6  ;;  %v3196_v6 = vpop.permute.xlu0 %3195 }
 0x5cf   : > { %v3548_v34 = vcombine.high %v3503_v56, %v3535_v35  ;;  %v3547_v2 = vcombine.low %v3503_v56, %v3535_v35  ;;  %v3550_v55 = vcombine.high %v3510_v26, %v3542_v23  ;;  %v3549_v50 = vcombine.low %v3510_v26, %v3542_v23 }
 0x5d0   : > { %v3262_v32 = vpop.permute.xlu1 %3261  ;;  %3833 = vrot.lane.b32.xlu1 %v3544_v16, %s4417_s11  ;;  %3831 = vrot.lane.b32.xlu0 %v3543_v30, %s4417_s11  ;;  %v3782_v49 = vrot.slane %v3768_v14, %v4593_v48 }
 0x5d1   : > { %v3719_v24 = vcombine.low %v3238_v44, %v3262_v32  ;;  %v3720_v57 = vcombine.high %v3238_v44, %v3262_v32 }
 0x5d2   : > { %v3208_v5 = vpop.permute.xlu0 %3207 }
 0x5d3   : > { %v3727_v47 = vrot.slane %v3719_v24, %v4550_v17  ;;  %v3734_v54 = vrot.slane %v3720_v57, %v4550_v17  ;;  %v3279_v27 = vcombine.low %v5411_v36, %v3208_v5 }
 0x5d4   : > { %v3274_v18 = vpop.permute.xlu1 %3273  ;;  %3837 = vrot.lane.b32.xlu1 %v3546_v39, %s4417_s11  ;;  %3835 = vrot.lane.b32.xlu0 %v3545_v19, %s4417_s11 }
 0x5d5   : > { %v3735_v62 = vcombine.low %v3250_v61, %v3274_v18  ;;  %v3736_v42 = vcombine.high %v3250_v61, %v3274_v18 }
 0x5d6   : > { %v3220_v16 = vpop.permute.xlu0 %3219 }
 0x5d7   : > { %v3743_v9 = vrot.slane %v3735_v62, %v4550_v17  ;;  %v3750_v22 = vrot.slane %v3736_v42, %v4550_v17  ;;  %v3295_v15 = vcombine.low %v3196_v6, %v3220_v16  ;;  %v3287_v42 = vrot.slane %v3279_v27, %v4550_v17 }
 0x5d8   : > { %3841 = vrot.lane.b32.xlu1 %v3548_v34, %s4417_s11  ;;  %3839 = vrot.lane.b32.xlu0 %v3547_v2, %s4417_s11  ;;  %v3296_v52 = vcombine.high %v3196_v6, %v3220_v16  ;;  %v3280_v2 = vcombine.high %v5411_v36, %v3208_v5 }
 0x5d9   : > { %v3783_v51 = vcombine.low %v3727_v47, %v3743_v9  ;;  %v3784_v53 = vcombine.high %v3727_v47, %v3743_v9  ;;  %v3799_v59 = vcombine.low %v3734_v54, %v3750_v22  ;;  %v3800_v44 = vcombine.high %v3734_v54, %v3750_v22 }
 0x5da   : > { %v5521_v30 = vpop.permute.xlu1 %3199  ;;  %v3232_v31 = vpop.permute.xlu0 %3231  ;;  %v3303_v18 = vrot.slane %v3295_v15, %v4550_v17 }
 0x5db   : > { %v3791_v41 = vrot.slane %v3783_v51, %v4593_v48  ;;  %v3798_v10 = vrot.slane %v3784_v53, %v4593_v48  ;;  %v3807_v12 = vrot.slane %v3799_v59, %v4593_v48  ;;  %v3814_v28 = vrot.slane %v3800_v44, %v4593_v48 }
 0x5dc   : > { %3845 = vrot.lane.b32.xlu1 %v3550_v55, %s4417_s11  ;;  %3843 = vrot.lane.b32.xlu0 %v3549_v50, %s4417_s11  ;;  %v3343_v9 = vcombine.low %v3287_v42, %v3303_v18  ;;  %v3310_v51 = vrot.slane %v3296_v52, %v4550_v17  ;;  %v3344_v8 = vcombine.high %v3287_v42, %v3303_v18 }
 0x5dd   : > { %v3816_v45 = vcombine.high %v3759_v1, %v3791_v41  ;;  %v3815_v43 = vcombine.low %v3759_v1, %v3791_v41  ;;  %v3818_v13 = vcombine.high %v3766_v58, %v3798_v10  ;;  %v3817_v4 = vcombine.low %v3766_v58, %v3798_v10 }
 0x5de   : > { %v3820_v46 = vcombine.high %v3775_v7, %v3807_v12  ;;  %v3819_v11 = vcombine.low %v3775_v7, %v3807_v12  ;;  %v3822_v61 = vcombine.high %v3782_v49, %v3814_v28  ;;  %v3821_v20 = vcombine.low %v3782_v49, %v3814_v28  ;;  %v5523_v0 = vpop.permute.xlu1 %3211  ;;  %v3244_v63 = vpop.permute.xlu0 %3243 }
 0x5df   : > { %v3351_v55 = vrot.slane %v3343_v9, %v4593_v48  ;;  %v3294_v1 = vrot.slane %v3280_v2, %v4550_v17  ;;  %v3358_v54 = vrot.slane %v3344_v8, %v4593_v48  ;;  %v3551_v44 = vcombine.low %v5435_v25, %v5523_v0 }
 0x5e0   : > { %3873 = vrot.lane.b32.xlu1 %v3816_v45, %s4417_s11  ;;  %3871 = vrot.lane.b32.xlu0 %v3815_v43, %s4417_s11 }
 0x5e1   : > { %v3359_v45 = vcombine.low %v3294_v1, %v3310_v51  ;;  %v3360_v28 = vcombine.high %v3294_v1, %v3310_v51  ;;  %v3559_v16 = vrot.slane %v3551_v44, %v4550_v17 }
 0x5e2   : > { %v5525_v32 = vpop.permute.xlu1 %3223  ;;  %v3256_v33 = vpop.permute.xlu0 %3255 }
 0x5e3   : > { %v3311_v24 = vcombine.low %v3232_v31, %v3256_v33  ;;  %v3312_v47 = vcombine.high %v3232_v31, %v3256_v33  ;;  %v3567_v10 = vcombine.low %v5521_v30, %v5525_v32  ;;  %v3374_v27 = vrot.slane %v3360_v28, %v4593_v48 }
 0x5e4   : > { %3877 = vrot.lane.b32.xlu1 %v3818_v13, %s4417_s11  ;;  %3875 = vrot.lane.b32.xlu0 %v3817_v4, %s4417_s11 }
 0x5e5   : > { %v3319_v37 = vrot.slane %v3311_v24, %v4550_v17  ;;  %v3326_v22 = vrot.slane %v3312_v47, %v4550_v17 }
 0x5e6   : > { %v5527_v3 = vpop.permute.xlu1 %3235  ;;  %v3268_v35 = vpop.permute.xlu0 %3267 }
 0x5e7   : > { %v3327_v39 = vcombine.low %v3244_v63, %v3268_v35  ;;  %v3328_v62 = vcombine.high %v3244_v63, %v3268_v35 }
 0x5e8   : > { %3881 = vrot.lane.b32.xlu1 %v3820_v46, %s4417_s11  ;;  %3879 = vrot.lane.b32.xlu0 %v3819_v11, %s4417_s11  ;;  %v3367_v46 = vrot.slane %v3359_v45, %v4593_v48 }
 0x5e9   : > { %v3335_v56 = vrot.slane %v3327_v39, %v4550_v17  ;;  %v3342_v26 = vrot.slane %v3328_v62, %v4550_v17  ;;  %v3568_v39 = vcombine.high %v5521_v30, %v5525_v32 }
 0x5ea   : > { %v5530_v19 = vpop.permute.xlu1 %3247 }
 0x5eb   : > { %v3375_v34 = vcombine.low %v3319_v37, %v3335_v56  ;;  %v3376_v60 = vcombine.high %v3319_v37, %v3335_v56  ;;  %v3391_v41 = vcombine.low %v3326_v22, %v3342_v26  ;;  %v3392_v12 = vcombine.high %v3326_v22, %v3342_v26 }
 0x5ec   : > { %3885 = vrot.lane.b32.xlu1 %v3822_v61, %s4417_s11  ;;  %3883 = vrot.lane.b32.xlu0 %v3821_v20, %s4417_s11  ;;  %s281_s11 = sadd.s32 %s4395_s15, %s4035_s10  ;;  %v3575_v61 = vrot.slane %v3567_v10, %v4550_v17 }
 0x5ed   : > { %p282_p4 = scmp.lt.s32.totalorder %s281_s11, 3  ;;  %v3383_v57 = vrot.slane %v3375_v34, %v4593_v48  ;;  %v3390_v50 = vrot.slane %v3376_v60, %v4593_v48  ;;  %v3399_v13 = vrot.slane %v3391_v41, %v4593_v48  ;;  %v3406_v31 = vrot.slane %v3392_v12, %v4593_v48 }
 0x5ee   : > { %v5537_v23 = vpop.permute.xlu1 %3259  ;;  %v3615_v56 = vcombine.low %v3559_v16, %v3575_v61  ;;  %v3616_v9 = vcombine.high %v3559_v16, %v3575_v61 }
 0x5ef   : > { %s5673_s11 = smov (!%p282_p4, %s281_s11), 3  ;;  %v3408_v40 = vcombine.high %v3351_v55, %v3383_v57  ;;  %v3407_v21 = vcombine.low %v3351_v55, %v3383_v57  ;;  %v3583_v59 = vcombine.low %v5527_v3, %v5537_v23  ;;  %v3410_v14 = vcombine.high %v3358_v54, %v3390_v50 }
 0x5f0   : > { %s4067_s15 = sshll.u32 %s5673_s11, 7  ;;  %v3409_v7 = vcombine.low %v3358_v54, %v3390_v50  ;;  %v3412_v35 = vcombine.high %v3367_v46, %v3399_v13  ;;  %v3411_v24 = vcombine.low %v3367_v46, %v3399_v13  ;;  %v3584_v18 = vcombine.high %v5527_v3, %v5537_v23 }
 0x5f1   : > { %s5552_s28 = scalar_lea.vmem %s5655_s4, %s4067_s15  ;;  %v3591_v20 = vrot.slane %v3583_v59, %v4550_v17  ;;  %v3414_v3 = vcombine.high %v3374_v27, %v3406_v31  ;;  %v3582_v23 = vrot.slane %v3568_v39, %v4550_v17  ;;  %v3413_v47 = vcombine.low %v3374_v27, %v3406_v31 }
 0x5f2   : > { %v3272_v53 = vpop.permute.xlu1 %3271  ;;  %v3630_v1 = vrot.slane %v3616_v9, %v4593_v48 }
 0x5f3   : > { %v3599_v36 = vcombine.low %v5530_v19, %v3272_v53  ;;  %v3600_v63 = vcombine.high %v5530_v19, %v3272_v53  ;;  %v3552_v19 = vcombine.high %v5435_v25, %v5523_v0  ;;  %v3623_v25 = vrot.slane %v3615_v56, %v4593_v48 }
 0x5f4   : > { %v3598_v0 = vrot.slane %v3584_v18, %v4550_v17 }
 0x5f5   : > { %v3607_v4 = vrot.slane %v3599_v36, %v4550_v17  ;;  %v3614_v30 = vrot.slane %v3600_v63, %v4550_v17  ;;  %v3566_v57 = vrot.slane %v3552_v19, %v4550_v17 }
 0x5f7   : > { %v3647_v33 = vcombine.low %v3591_v20, %v3607_v4  ;;  %v3648_v32 = vcombine.high %v3591_v20, %v3607_v4  ;;  %v3663_v8 = vcombine.low %v3598_v0, %v3614_v30  ;;  %v3631_v41 = vcombine.low %v3566_v57, %v3582_v23 }
 0x5f9   : > { %v3655_v34 = vrot.slane %v3647_v33, %v4593_v48  ;;  %v3662_v51 = vrot.slane %v3648_v32, %v4593_v48  ;;  %v3639_v10 = vrot.slane %v3631_v41, %v4593_v48 }
 0x5fb   : > { %v3680_v22 = vcombine.high %v3623_v25, %v3655_v34  ;;  %v3679_v55 = vcombine.low %v3623_v25, %v3655_v34  ;;  %v3682_v54 = vcombine.high %v3630_v1, %v3662_v51 }
 0x642   : > { %v3834_v43 = vpop.permute.xlu1 %3833  ;;  %v3832_v38 = vpop.permute.xlu0 %3831 }
 0x643   : > { %v3856_v58 = vsel %vm1043_vm0, %v3408_v40, %v3834_v43  ;;  %v3855_v29 = vsel %vm1043_vm0, %v3407_v21, %v3832_v38  ;;  %v3664_v40 = vcombine.high %v3598_v0, %v3614_v30  ;;  %v3671_v21 = vrot.slane %v3663_v8, %v4593_v48 }
 0x644   : > { %3905 = vst.msk [vmem:[%s5552_s28 + $0x10] sm:$0xff] %vm1048_vm1, %v3856_v58  ;;  %3903 = vst.msk [vmem:[%s5552_s28] sm:$0xff] %vm1048_vm1, %v3855_v29  ;;  %v3681_v43 = vcombine.low %v3630_v1, %v3662_v51  ;;  %v3632_v38 = vcombine.high %v3566_v57, %v3582_v23 }
 0x645   : > { %v3678_v44 = vrot.slane %v3664_v40, %v4593_v48  ;;  %v3684_v12 = vcombine.high %v3639_v10, %v3671_v21  ;;  %v3683_v4 = vcombine.low %v3639_v10, %v3671_v21 }
 0x646   : > { %v3838_v11 = vpop.permute.xlu1 %3837  ;;  %v3836_v49 = vpop.permute.xlu0 %3835 }
 0x647   : > { %v3858_v6 = vsel %vm1043_vm0, %v3410_v14, %v3838_v11  ;;  %v3857_v5 = vsel %vm1043_vm0, %v3409_v7, %v3836_v49  ;;  %v3646_v14 = vrot.slane %v3632_v38, %v4593_v48 }
 0x648   : > { %3909 = vst.msk [vmem:[%s5552_s28 + $0x30] sm:$0xff] %vm1048_vm1, %v3858_v6  ;;  %3907 = vst.msk [vmem:[%s5552_s28 + $0x20] sm:$0xff] %vm1048_vm1, %v3857_v5 }
 0x649   : > { %v3686_v11 = vcombine.high %v3646_v14, %v3678_v44  ;;  %v3685_v61 = vcombine.low %v3646_v14, %v3678_v44 }
 0x64a   : > { %v3842_v15 = vpop.permute.xlu1 %3841  ;;  %v3840_v62 = vpop.permute.xlu0 %3839 }
 0x64b   : > { %v3860_v37 = vsel %vm1043_vm0, %v3412_v35, %v3842_v15  ;;  %v3859_v42 = vsel %vm1043_vm0, %v3411_v24, %v3840_v62 }
 0x64c   : > { %3913 = vst.msk [vmem:[%s5552_s28 + $0x50] sm:$0xff] %vm1048_vm1, %v3860_v37  ;;  %3911 = vst.msk [vmem:[%s5552_s28 + $0x40] sm:$0xff] %vm1048_vm1, %v3859_v42 }
 0x64e   : > { %v3846_v52 = vpop.permute.xlu1 %3845  ;;  %v3844_v26 = vpop.permute.xlu0 %3843 }
 0x64f   : > { %v3862_v2 = vsel %vm1043_vm0, %v3414_v3, %v3846_v52  ;;  %v3861_v60 = vsel %vm1043_vm0, %v3413_v47, %v3844_v26 }
 0x650   : > { %3917 = vst.msk [vmem:[%s5552_s28 + $0x70] sm:$0xff] %vm1048_vm1, %v3862_v2  ;;  %3915 = vst.msk [vmem:[%s5552_s28 + $0x60] sm:$0xff] %vm1048_vm1, %v3861_v60 }
 0x652   : > { %v3874_v53 = vpop.permute.xlu1 %3873  ;;  %v3872_v36 = vpop.permute.xlu0 %3871 }
 0x653   : > { %v3896_v50 = vsel %vm1043_vm0, %v3680_v22, %v3874_v53  ;;  %v3895_v17 = vsel %vm1043_vm0, %v3679_v55, %v3872_v36 }
 0x654   : > { %3906 = vst.msk [vmem:[%s5552_s28 + $0x18] sm:$0xff] %vm1048_vm1, %v3896_v50  ;;  %3904 = vst.msk [vmem:[%s5552_s28 + $0x8] sm:$0xff] %vm1048_vm1, %v3895_v17 }
 0x656   : > { %v3878_v45 = vpop.permute.xlu1 %3877  ;;  %v3876_v58 = vpop.permute.xlu0 %3875 }
 0x657   : > { %v3898_v59 = vsel %vm1043_vm0, %v3682_v54, %v3878_v45  ;;  %v3897_v29 = vsel %vm1043_vm0, %v3681_v43, %v3876_v58 }
 0x658   : > { %3910 = vst.msk [vmem:[%s5552_s28 + $0x38] sm:$0xff] %vm1048_vm1, %v3898_v59  ;;  %3908 = vst.msk [vmem:[%s5552_s28 + $0x28] sm:$0xff] %vm1048_vm1, %v3897_v29 }
 0x65a   : > { %v3882_v13 = vpop.permute.xlu1 %3881  ;;  %v3880_v28 = vpop.permute.xlu0 %3879 }
 0x65b   : > { %v3900_v7 = vsel %vm1043_vm0, %v3684_v12, %v3882_v13  ;;  %v3899_v46 = vsel %vm1043_vm0, %v3683_v4, %v3880_v28 }
 0x65c   : > { %3914 = vst.msk [vmem:[%s5552_s28 + $0x58] sm:$0xff] %vm1048_vm1, %v3900_v7  ;;  %3912 = vst.msk [vmem:[%s5552_s28 + $0x48] sm:$0xff] %vm1048_vm1, %v3899_v46 }
 0x65e   : > { %v3886_v49 = vpop.permute.xlu1 %3885  ;;  %v3884_v6 = vpop.permute.xlu0 %3883 }
 0x65f   : > { %v3902_v20 = vsel %vm1043_vm0, %v3686_v11, %v3886_v49  ;;  %v3901_v5 = vsel %vm1043_vm0, %v3685_v61, %v3884_v6 }
 0x660   : > { %3918 = vst.msk [vmem:[%s5552_s28 + $0x78] sm:$0xff] %vm1048_vm1, %v3902_v20  ;;  %3916 = vst.msk [vmem:[%s5552_s28 + $0x68] sm:$0xff] %vm1048_vm1, %v3901_v5 }
 0x661 PF: > { %s15_s19 = sadd.s32 1, %s4411_s19   ;;  %s5658_s15 = smov %s4403_s17 }
 0x662   : > { %p12_p5 = scmp.ge.s32.totalorder %s15_s19, 6   ;;  %s5659_s16 = smov %s4407_s18 }
 0x663   : > { %s5660_s17 = smov %s5663_s21  ;;  %s5661_s18 = smov %s5667_s22 }
 0x664   :  { %14 = sbr.rel (!%p12_p5) target bundleno = 3 (0x3), region = 74 }
 0x66b   :  { %3946 = vsyncpa [#allocation3], 1 }
 0x66c   :  { %3948 = vsyncpa [#allocation3 + $0x1], 1 }

</bundles_post_ra>
